<compile_context>
chip_gen: v7x
topology: tpu7x:2x2x1
jax: 0.10.0
libtpu: 0.0.40
codegen_flags: <defaults>
</compile_context>

<pallas_src>
import functools

import jax
import jax.numpy as jnp
from jax import lax
from jax.experimental import pallas as pl
from jax.experimental.pallas import tpu as pltpu


# ----------------------------------------------------------------------------
# Fused bidirectional LSTM recurrence.
# grid = (NB, K); each grid step runs `tc` timesteps of BOTH directions for
# one batch block.  Forward reads/writes time-chunk k, backward K-1-k.
# ----------------------------------------------------------------------------
def _bilstm_chunk_kernel(gxf_ref, gxb_ref, whhf_ref, whhb_ref, bf_ref, bb_ref,
                         outf_ref, outb_ref, state_ref,
                         *, seq_len, chunk, num_chunks, masked):
    H = whhf_ref.shape[0]
    k = pl.program_id(1)

    @pl.when(k == 0)
    def _():
        state_ref[...] = jnp.zeros_like(state_ref)

    w_f = whhf_ref[...]                    # (H, 4H) bf16, resident this chunk
    w_b = whhb_ref[...]
    bias_f = bf_ref[...]                   # (1, 4H) f32 -- bias add stays f32
    bias_b = bb_ref[...]

    def cell(gx, bias, h, c, w):
        # gx: bf16 (B, 4H) precomputed x @ W_ih^T; recurrent matmul bf16 x bf16
        # with f32 accumulation; gate activations and state stay f32.
        gates = (gx.astype(jnp.float32) + bias
                 + jnp.dot(h.astype(jnp.bfloat16), w,
                           preferred_element_type=jnp.float32))   # (B, 4H)
        i_g = jax.nn.sigmoid(gates[:, 0 * H:1 * H])
        f_g = jax.nn.sigmoid(gates[:, 1 * H:2 * H])
        g_g = jnp.tanh(gates[:, 2 * H:3 * H])
        o_g = jax.nn.sigmoid(gates[:, 3 * H:4 * H])
        c_new = f_g * c + i_g * g_g
        h_new = o_g * jnp.tanh(c_new)
        return h_new, c_new

    def body(j, carry):
        hf, cf, hb, cb = carry
        sb = chunk - 1 - j                 # backward position within its chunk
        hf_n, cf_n = cell(gxf_ref[j], bias_f, hf, cf, w_f)
        hb_n, cb_n = cell(gxb_ref[sb], bias_b, hb, cb, w_b)
        if masked:                         # static flag: only when T was padded
            vf = (k * chunk + j) < seq_len
            vb = ((num_chunks - 1 - k) * chunk + sb) < seq_len
            hf_n = jnp.where(vf, hf_n, hf)
            cf_n = jnp.where(vf, cf_n, cf)
            hb_n = jnp.where(vb, hb_n, hb)
            cb_n = jnp.where(vb, cb_n, cb)
        outf_ref[j] = hf_n
        outb_ref[sb] = hb_n
        return hf_n, cf_n, hb_n, cb_n

    # (h, c) carried as values across the chunk; VMEM state scratch is touched
    # only once per chunk (for cross-chunk persistence).
    init = (state_ref[0], state_ref[1], state_ref[2], state_ref[3])
    hf, cf, hb, cb = lax.fori_loop(0, chunk, body, init, unroll=min(chunk, 8))
    state_ref[0] = hf
    state_ref[1] = cf
    state_ref[2] = hb
    state_ref[3] = cb


def _choose_chunk(T, max_chunk=32):
    """Returns (tc, num_chunks, needs_pad_mask)."""
    best = 1
    for c in range(1, min(T, max_chunk) + 1):
        if T % c == 0:
            best = c
    if best * 4 >= min(T, max_chunk):      # a reasonable divisor exists
        return best, T // best, False
    K = -(-T // max_chunk)                 # pad + mask instead of tc=1 fallback
    tc = -(-T // K)
    return tc, K, True


def _choose_batch_block(B):
    # Split batch across a leading "parallel" grid axis when it can be tiled
    # in multiples of 8 (sublane) -- feeds the second TensorCore on v7x.
    if B >= 16 and B % 16 == 0:
        return B // 2
    return B


def bilstm_layer(gx_f, gx_b, b_f, b_b, w_hh_f, w_hh_b):
    """gx_f/gx_b: (T, B, 4H) bf16 gate pre-activations WITHOUT biases.
    b_f/b_b: (1, 4H) f32.  w_hh_f/w_hh_b: (H, 4H) bf16.
    Returns (out_f, out_b), each (T, B, H) f32."""
    T, B, G4 = gx_f.shape
    H = w_hh_f.shape[0]
    tc, K, padded = _choose_chunk(T)
    T_pad = tc * K
    if padded:
        pad = ((0, T_pad - T), (0, 0), (0, 0))
        gx_f = jnp.pad(gx_f, pad)
        gx_b = jnp.pad(gx_b, pad)

    b_blk = _choose_batch_block(B)
    NB = B // b_blk

    kernel = functools.partial(_bilstm_chunk_kernel,
                               seq_len=T, chunk=tc, num_chunks=K,
                               masked=padded)

    # VMEM budget: double-buffered bf16 gx chunks + bf16 weights + f32 output
    # chunks + biases + (4, b_blk, H) f32 state scratch, with headroom.
    work_bytes = (2 * 2 * tc * b_blk * G4 * 2      # gx, both dirs, 2 buffers
                  + 2 * 2 * H * G4 * 2             # W_hh, both dirs, 2 buffers
                  + 2 * 2 * G4 * 4                 # biases
                  + 2 * 2 * tc * b_blk * H * 4     # outputs, both dirs
                  + 4 * b_blk * H * 4)             # state scratch
    vmem_limit = int(min(2 * work_bytes + (8 << 20), 64 << 20))

    flops = 2 * (2 * T_pad * B * H * G4)           # recurrent matmuls, both dirs
    trans = 2 * T_pad * B * G4                     # sigmoid/tanh per gate elem
    bytes_acc = ((gx_f.size + gx_b.size) * 2
                 + (w_hh_f.size + w_hh_b.size) * 2
                 + 2 * T_pad * B * H * 4)

    out_f, out_b = pl.pallas_call(
        kernel,
        out_shape=(jax.ShapeDtypeStruct((T_pad, B, H), jnp.float32),
                   jax.ShapeDtypeStruct((T_pad, B, H), jnp.float32)),
        grid_spec=pltpu.PrefetchScalarGridSpec(
            num_scalar_prefetch=0,
            grid=(NB, K),
            in_specs=[
                pl.BlockSpec((tc, b_blk, G4), lambda b, k: (k, b, 0)),
                pl.BlockSpec((tc, b_blk, G4), lambda b, k: (K - 1 - k, b, 0)),
                pl.BlockSpec((H, G4), lambda b, k: (0, 0)),
                pl.BlockSpec((H, G4), lambda b, k: (0, 0)),
                pl.BlockSpec((1, G4), lambda b, k: (0, 0)),
                pl.BlockSpec((1, G4), lambda b, k: (0, 0)),
            ],
            out_specs=[
                pl.BlockSpec((tc, b_blk, H), lambda b, k: (k, b, 0)),
                pl.BlockSpec((tc, b_blk, H), lambda b, k: (K - 1 - k, b, 0)),
            ],
            scratch_shapes=[
                pltpu.VMEM((4, b_blk, H), jnp.float32),   # hf, cf, hb, cb
            ],
        ),
        compiler_params=pltpu.CompilerParams(
            dimension_semantics=("parallel", "arbitrary"),
            vmem_limit_bytes=vmem_limit),
        cost_estimate=pl.CostEstimate(flops=flops, transcendentals=trans,
                                      bytes_accessed=bytes_acc),
    )(gx_f, gx_b, w_hh_f, w_hh_b, b_f, b_b)

    if padded:
        out_f = out_f[:T]
        out_b = out_b[:T]
    return out_f, out_b


# ----------------------------------------------------------------------------
# Hoisted input projections (bf16 operands, f32 accumulate, bf16 gx output).
# ----------------------------------------------------------------------------
def _project_first(seq, w_cat):
    """seq: (T, B, E) f32; w_cat: (E, 8H) bf16.  Returns two (T, B, 4H) bf16."""
    T, B, E = seq.shape
    G4 = w_cat.shape[1] // 2
    g = jnp.dot(seq.reshape(T * B, E).astype(jnp.bfloat16), w_cat,
                preferred_element_type=jnp.float32)
    gf = g[:, :G4].reshape(T, B, G4).astype(jnp.bfloat16)
    gb = g[:, G4:].reshape(T, B, G4).astype(jnp.bfloat16)
    return gf, gb


def _project_pair(out_f, out_b, w_top, w_bot):
    """Next-layer projection without concatenating (out_f | out_b)."""
    T, B, H = out_f.shape
    G4 = w_top.shape[1] // 2
    g = (jnp.dot(out_f.reshape(T * B, H).astype(jnp.bfloat16), w_top,
                 preferred_element_type=jnp.float32)
         + jnp.dot(out_b.reshape(T * B, H).astype(jnp.bfloat16), w_bot,
                   preferred_element_type=jnp.float32))
    gf = g[:, :G4].reshape(T, B, G4).astype(jnp.bfloat16)
    gb = g[:, G4:].reshape(T, B, G4).astype(jnp.bfloat16)
    return gf, gb


# ----------------------------------------------------------------------------
# Classifier: Linear(2H -> 1024) -> Linear(1024 -> 1) -> Sigmoid, fused.
# Takes out_f[-1], out_b[-1] separately (no (B, 2H) concat needed).
# ----------------------------------------------------------------------------
def _classifier_kernel(xf_ref, xb_ref, w1f_ref, w1b_ref, b1_ref, w2_ref, b2_ref,
                       out_ref):
    h = (jnp.dot(xf_ref[...], w1f_ref[...], preferred_element_type=jnp.float32)
         + jnp.dot(xb_ref[...], w1b_ref[...], preferred_element_type=jnp.float32)
         + b1_ref[...])                                          # (B, 1024)
    # Linear(1024 -> 1) as VPU multiply + lane reduction (avoids N=1 MXU op).
    y = jnp.sum(h * w2_ref[...], axis=-1, keepdims=True) + b2_ref[...]   # (B, 1)
    out_ref[...] = jax.nn.sigmoid(y)


def classifier(x_f, x_b, w1_top, w1_bot, b1, w2_row, b2):
    B, H = x_f.shape
    Dh = w1_top.shape[1]
    return pl.pallas_call(
        _classifier_kernel,
        out_shape=jax.ShapeDtypeStruct((B, 1), jnp.float32),
        in_specs=[
            pl.BlockSpec((B, H), lambda: (0, 0)),
            pl.BlockSpec((B, H), lambda: (0, 0)),
            pl.BlockSpec((H, Dh), lambda: (0, 0)),
            pl.BlockSpec((H, Dh), lambda: (0, 0)),
            pl.BlockSpec((1, Dh), lambda: (0, 0)),
            pl.BlockSpec((1, Dh), lambda: (0, 0)),
            pl.BlockSpec((1, 1), lambda: (0, 0)),
        ],
        out_specs=pl.BlockSpec((B, 1), lambda: (0, 0)),
        cost_estimate=pl.CostEstimate(
            flops=4 * B * H * Dh + 2 * B * Dh,
            transcendentals=B,
            bytes_accessed=4 * (2 * B * H + 2 * H * Dh + 2 * Dh + B + 1)),
    )(x_f, x_b, w1_top, w1_bot, b1, w2_row, b2)


# ----------------------------------------------------------------------------
# Full forward pass (embedding lookup & layer plumbing in plain JAX).
# ----------------------------------------------------------------------------
def lstm_net_forward(token_ids, params):
    """token_ids: (B, T) int32.  Returns (B, 1) f32 in [0, 1]."""
    emb = params["embedding"]                       # (vocab, E)
    x = jnp.take(emb, token_ids, axis=0)            # (B, T, E) embedding lookup
    seq = jnp.transpose(x, (1, 0, 2))               # (T, B, E) time-major

    layers = params["lstm_layers"]
    l0 = layers[0]
    gx_f, gx_b = _project_first(seq, l0["w_cat"])
    out_f, out_b = bilstm_layer(gx_f, gx_b, l0["b_f"], l0["b_b"],
                                l0["whh_f"], l0["whh_b"])
    for layer in layers[1:]:
        gx_f, gx_b = _project_pair(out_f, out_b, layer["w_top"], layer["w_bot"])
        out_f, out_b = bilstm_layer(gx_f, gx_b, layer["b_f"], layer["b_b"],
                                    layer["whh_f"], layer["whh_b"])

    # PyTorch x[:, -1, :] = [fwd hidden at t=T-1 | bwd hidden at t=T-1].
    # Dropout layers are identity at inference.
    return classifier(out_f[-1], out_b[-1], params["w1_top"], params["w1_bot"],
                      params["b1"], params["w2_row"], params["b2"])


# ----------------------------------------------------------------------------
# Deterministic parameter construction (PyTorch-style uniform init); all
# transposes / concats / splits / bf16 casts precomputed here, not per call.
# ----------------------------------------------------------------------------
def make_params(key, vocab, emb_dim, hidden_dim, num_layers):
    def uniform(k, shape, bound):
        return jax.random.uniform(k, shape, jnp.float32, -bound, bound)

    keys = iter(jax.random.split(key, 8 * num_layers + 8))
    params = {"embedding": jax.random.normal(next(keys), (vocab, emb_dim),
                                             jnp.float32)}
    H = hidden_dim
    bound = 1.0 / (H ** 0.5)

    layers = []
    for layer_idx in range(num_layers):
        d_in = emb_dim if layer_idx == 0 else 2 * H
        raw = {}
        for direction in ("fwd", "bwd"):
            raw[direction] = {
                "w_ih": uniform(next(keys), (4 * H, d_in), bound),
                "w_hh": uniform(next(keys), (4 * H, H), bound),
                "b_ih": uniform(next(keys), (4 * H,), bound),
                "b_hh": uniform(next(keys), (4 * H,), bound),
            }
        layer = {
            "whh_f": raw["fwd"]["w_hh"].T.astype(jnp.bfloat16),     # (H, 4H)
            "whh_b": raw["bwd"]["w_hh"].T.astype(jnp.bfloat16),
            "b_f": (raw["fwd"]["b_ih"] + raw["fwd"]["b_hh"]).reshape(1, 4 * H),
            "b_b": (raw["bwd"]["b_ih"] + raw["bwd"]["b_hh"]).reshape(1, 4 * H),
        }
        # Gate order i, f, g, o (PyTorch).  (d_in, 8H) = [W_ih_f^T | W_ih_b^T].
        w_cat = jnp.concatenate([raw["fwd"]["w_ih"].T, raw["bwd"]["w_ih"].T],
                                axis=1).astype(jnp.bfloat16)
        if layer_idx == 0:
            layer["w_cat"] = w_cat                   # (E, 8H)
        else:
            layer["w_top"] = w_cat[:H]               # multiplies prev out_f
            layer["w_bot"] = w_cat[H:]               # multiplies prev out_b
        layers.append(layer)
    params["lstm_layers"] = layers

    d_cls = 2 * H
    b1 = 1.0 / (d_cls ** 0.5)
    w1_t = uniform(next(keys), (1024, d_cls), b1).T  # (2H, 1024)
    params["w1_top"] = w1_t[:H]
    params["w1_bot"] = w1_t[H:]
    params["b1"] = uniform(next(keys), (1, 1024), b1)
    b2 = 1.0 / (1024 ** 0.5)
    params["w2_row"] = uniform(next(keys), (1, 1024), b2)   # Linear(1024,1) as row
    params["b2"] = uniform(next(keys), (1, 1), b2)
    return params


if __name__ == "__main__":
    VOCAB, EMB, HIDDEN, LAYERS = 32, 16, 32, 2
    B, T = 2, 8

    key = jax.random.PRNGKey(0)
    k_param, k_in = jax.random.split(key)
    params = make_params(k_param, VOCAB, EMB, HIDDEN, LAYERS)
    token_ids = jax.random.randint(k_in, (B, T), 0, VOCAB, dtype=jnp.int32)

    out = jax.jit(functools.partial(lstm_net_forward, params=params))(token_ids)
    out = jax.block_until_ready(out)
    assert out.shape == (B, 1) and out.dtype == jnp.float32
    assert bool(jnp.all((out >= 0.0) & (out <= 1.0)))
    print("KERNEL_OK")
</pallas_src>

<mosaic_0001>
module attributes {stable_mosaic.version = 11 : i64} {
  func.func @_classifier_kernel(%arg0: memref<2x32xf32, #tpu.memory_space<vmem>>, %arg1: memref<2x32xf32, #tpu.memory_space<vmem>>, %arg2: memref<32x1024xf32, #tpu.memory_space<vmem>>, %arg3: memref<32x1024xf32, #tpu.memory_space<vmem>>, %arg4: memref<1x1024xf32, #tpu.memory_space<vmem>>, %arg5: memref<1x1024xf32, #tpu.memory_space<vmem>>, %arg6: memref<1x1xf32, #tpu.memory_space<vmem>>, %arg7: memref<2x1xf32, #tpu.memory_space<vmem>>) attributes {dimension_semantics = [], scalar_prefetch = 0 : i64, scratch_operands = 0 : i64, tpu.core_type = #tpu.core_type<tc>} {
    %c0 = arith.constant 0 : index
    %c0_0 = arith.constant 0 : index
    %0 = vector.load %arg0[%c0, %c0_0] : memref<2x32xf32, #tpu.memory_space<vmem>>, vector<2x32xf32>
    %c0_1 = arith.constant 0 : index
    %c0_2 = arith.constant 0 : index
    %1 = vector.load %arg2[%c0_1, %c0_2] : memref<32x1024xf32, #tpu.memory_space<vmem>>, vector<32x1024xf32>
    %cst = arith.constant dense<0.000000e+00> : vector<2x1024xf32>
    %2 = tpu.matmul %0, %1, %cst {dimension_numbers = #tpu.dot_dimension_numbers<[1], [0], [0], [1], [0, 0, 1, 1], [], []>} : vector<2x32xf32>, vector<32x1024xf32>, vector<2x1024xf32> -> vector<2x1024xf32>
    %c0_3 = arith.constant 0 : index
    %c0_4 = arith.constant 0 : index
    %3 = vector.load %arg1[%c0_3, %c0_4] : memref<2x32xf32, #tpu.memory_space<vmem>>, vector<2x32xf32>
    %c0_5 = arith.constant 0 : index
    %c0_6 = arith.constant 0 : index
    %4 = vector.load %arg3[%c0_5, %c0_6] : memref<32x1024xf32, #tpu.memory_space<vmem>>, vector<32x1024xf32>
    %cst_7 = arith.constant dense<0.000000e+00> : vector<2x1024xf32>
    %5 = tpu.matmul %3, %4, %cst_7 {dimension_numbers = #tpu.dot_dimension_numbers<[1], [0], [0], [1], [0, 0, 1, 1], [], []>} : vector<2x32xf32>, vector<32x1024xf32>, vector<2x1024xf32> -> vector<2x1024xf32>
    %6 = arith.addf %2, %5 : vector<2x1024xf32>
    %c0_8 = arith.constant 0 : index
    %c0_9 = arith.constant 0 : index
    %7 = vector.load %arg4[%c0_8, %c0_9] : memref<1x1024xf32, #tpu.memory_space<vmem>>, vector<1x1024xf32>
    %8 = vector.broadcast %7 : vector<1x1024xf32> to vector<2x1024xf32>
    %9 = arith.addf %6, %8 : vector<2x1024xf32>
    %c0_10 = arith.constant 0 : index
    %c0_11 = arith.constant 0 : index
    %10 = vector.load %arg5[%c0_10, %c0_11] : memref<1x1024xf32, #tpu.memory_space<vmem>>, vector<1x1024xf32>
    %11 = vector.broadcast %10 : vector<1x1024xf32> to vector<2x1024xf32>
    %12 = arith.mulf %9, %11 : vector<2x1024xf32>
    %cst_12 = arith.constant dense<0.000000e+00> : vector<2xf32>
    %13 = vector.multi_reduction <add>, %12, %cst_12 [1] : vector<2x1024xf32> to vector<2xf32>
    %14 = vector.shape_cast %13 : vector<2xf32> to vector<2x1xf32>
    %c0_13 = arith.constant 0 : index
    %c0_14 = arith.constant 0 : index
    %15 = vector.load %arg6[%c0_13, %c0_14] : memref<1x1xf32, #tpu.memory_space<vmem>>, vector<1x1xf32>
    %16 = vector.broadcast %15 : vector<1x1xf32> to vector<2x1xf32>
    %17 = arith.addf %14, %16 : vector<2x1xf32>
    %18 = arith.negf %17 : vector<2x1xf32>
    %19 = math.exp %18 : vector<2x1xf32>
    %cst_15 = arith.constant 1.000000e+00 : f32
    %20 = vector.broadcast %cst_15 : f32 to vector<2x1xf32>
    %21 = arith.addf %20, %19 : vector<2x1xf32>
    %22 = arith.divf %20, %21 : vector<2x1xf32>
    %c0_16 = arith.constant 0 : index
    %c0_17 = arith.constant 0 : index
    %23 = vector.load %arg7[%c0_16, %c0_17] : memref<2x1xf32, #tpu.memory_space<vmem>>, vector<2x1xf32>
    tpu.vector_store %arg7[%c0_16, %c0_17], %22 {strides = array<i32>} : memref<2x1xf32, #tpu.memory_space<vmem>>, vector<2x1xf32>,
    return
  }
}

module attributes {stable_mosaic.version = 11 : i64} {
  func.func @_bilstm_chunk_kernel(%arg0: i32, %arg1: i32, %arg2: memref<8x2x128xbf16, #tpu.memory_space<vmem>>, %arg3: memref<8x2x128xbf16, #tpu.memory_space<vmem>>, %arg4: memref<32x128xbf16, #tpu.memory_space<vmem>>, %arg5: memref<32x128xbf16, #tpu.memory_space<vmem>>, %arg6: memref<1x128xf32, #tpu.memory_space<vmem>>, %arg7: memref<1x128xf32, #tpu.memory_space<vmem>>, %arg8: memref<8x2x32xf32, #tpu.memory_space<vmem>>, %arg9: memref<8x2x32xf32, #tpu.memory_space<vmem>>, %arg10: memref<4x2x32xf32, #tpu.memory_space<vmem>>) attributes {dimension_semantics = [#tpu.dimension_semantics<parallel>, #tpu.dimension_semantics<arbitrary>], iteration_bounds = array<i64: 1, 1>, scalar_prefetch = 0 : i64, scratch_operands = 1 : i64, tpu.core_type = #tpu.core_type<tc>, window_params = [{transform_indices = @transform_0, window_bounds = array<i64: 8, 2, 128>}, {transform_indices = @transform_1, window_bounds = array<i64: 8, 2, 128>}, {pipeline_mode = #tpu.pipeline_mode<synchronous>, transform_indices = @transform_2, window_bounds = array<i64: 32, 128>}, {pipeline_mode = #tpu.pipeline_mode<synchronous>, transform_indices = @transform_3, window_bounds = array<i64: 32, 128>}, {pipeline_mode = #tpu.pipeline_mode<synchronous>, transform_indices = @transform_4, window_bounds = array<i64: 1, 128>}, {pipeline_mode = #tpu.pipeline_mode<synchronous>, transform_indices = @transform_5, window_bounds = array<i64: 1, 128>}, {transform_indices = @transform_6, window_bounds = array<i64: 8, 2, 32>}, {transform_indices = @transform_7, window_bounds = array<i64: 8, 2, 32>}]} {
    %c0_i32 = arith.constant 0 : i32
    %0 = arith.cmpi eq, %arg1, %c0_i32 : i32
    %1 = arith.extui %0 : i1 to i32
    %c0_i32_0 = arith.constant 0 : i32
    %2 = arith.cmpi ne, %1, %c0_i32_0 : i32
    scf.if %2 {
      %cst_165 = arith.constant 0.000000e+00 : f32
      %643 = vector.broadcast %cst_165 : f32 to vector<4x2x32xf32>
      %c0_166 = arith.constant 0 : index
      %c0_167 = arith.constant 0 : index
      %c0_168 = arith.constant 0 : index
      %644 = vector.load %arg10[%c0_166, %c0_167, %c0_168] : memref<4x2x32xf32, #tpu.memory_space<vmem>>, vector<4x2x32xf32>
      tpu.vector_store %arg10[%c0_166, %c0_167, %c0_168], %643 {strides = array<i32>} : memref<4x2x32xf32, #tpu.memory_space<vmem>>, vector<4x2x32xf32>,
    } else {
    }
    %c0 = arith.constant 0 : index
    %c0_1 = arith.constant 0 : index
    %3 = vector.load %arg4[%c0, %c0_1] : memref<32x128xbf16, #tpu.memory_space<vmem>>, vector<32x128xbf16>
    %c0_2 = arith.constant 0 : index
    %c0_3 = arith.constant 0 : index
    %4 = vector.load %arg5[%c0_2, %c0_3] : memref<32x128xbf16, #tpu.memory_space<vmem>>, vector<32x128xbf16>
    %c0_4 = arith.constant 0 : index
    %c0_5 = arith.constant 0 : index
    %5 = vector.load %arg6[%c0_4, %c0_5] : memref<1x128xf32, #tpu.memory_space<vmem>>, vector<1x128xf32>
    %c0_6 = arith.constant 0 : index
    %c0_7 = arith.constant 0 : index
    %6 = vector.load %arg7[%c0_6, %c0_7] : memref<1x128xf32, #tpu.memory_space<vmem>>, vector<1x128xf32>
    %c0_8 = arith.constant 0 : index
    %c0_9 = arith.constant 0 : index
    %c0_10 = arith.constant 0 : index
    %7 = vector.load %arg10[%c0_8, %c0_9, %c0_10] : memref<4x2x32xf32, #tpu.memory_space<vmem>>, vector<1x2x32xf32>
    %8 = vector.shape_cast %7 : vector<1x2x32xf32> to vector<2x32xf32>
    %c1 = arith.constant 1 : index
    %c0_11 = arith.constant 0 : index
    %c0_12 = arith.constant 0 : index
    %9 = vector.load %arg10[%c1, %c0_11, %c0_12] : memref<4x2x32xf32, #tpu.memory_space<vmem>>, vector<1x2x32xf32>
    %10 = vector.shape_cast %9 : vector<1x2x32xf32> to vector<2x32xf32>
    %c2 = arith.constant 2 : index
    %c0_13 = arith.constant 0 : index
    %c0_14 = arith.constant 0 : index
    %11 = vector.load %arg10[%c2, %c0_13, %c0_14] : memref<4x2x32xf32, #tpu.memory_space<vmem>>, vector<1x2x32xf32>
    %12 = vector.shape_cast %11 : vector<1x2x32xf32> to vector<2x32xf32>
    %c3 = arith.constant 3 : index
    %c0_15 = arith.constant 0 : index
    %c0_16 = arith.constant 0 : index
    %13 = vector.load %arg10[%c3, %c0_15, %c0_16] : memref<4x2x32xf32, #tpu.memory_space<vmem>>, vector<1x2x32xf32>
    %14 = vector.shape_cast %13 : vector<1x2x32xf32> to vector<2x32xf32>
    %c0_i32_17 = arith.constant 0 : i32
    %c7_i32 = arith.constant 7 : i32
    %15 = arith.subi %c7_i32, %c0_i32_17 : i32
    %16 = arith.index_cast %c0_i32_17 : i32 to index
    %c0_18 = arith.constant 0 : index
    %c0_19 = arith.constant 0 : index
    %17 = vector.load %arg2[%16, %c0_18, %c0_19] : memref<8x2x128xbf16, #tpu.memory_space<vmem>>, vector<1x2x128xbf16>
    %18 = vector.shape_cast %17 : vector<1x2x128xbf16> to vector<2x128xbf16>
    %19 = arith.extf %18 : vector<2x128xbf16> to vector<2x128xf32>
    %20 = vector.broadcast %5 : vector<1x128xf32> to vector<2x128xf32>
    %21 = arith.addf %19, %20 : vector<2x128xf32>
    %22 = arith.truncf %8 : vector<2x32xf32> to vector<2x32xbf16>
    %cst = arith.constant dense<0.000000e+00> : vector<2x128xf32>
    %23 = tpu.matmul %22, %3, %cst {dimension_numbers = #tpu.dot_dimension_numbers<[1], [0], [0], [1], [0, 0, 1, 1], [], []>} : vector<2x32xbf16>, vector<32x128xbf16>, vector<2x128xf32> -> vector<2x128xf32>
    %24 = arith.addf %21, %23 : vector<2x128xf32>
    %25 = vector.extract_strided_slice %24 {offsets = [0, 0], sizes = [2, 32], strides = [1, 1]} : vector<2x128xf32> to vector<2x32xf32>
    %26 = arith.negf %25 : vector<2x32xf32>
    %27 = math.exp %26 : vector<2x32xf32>
    %cst_20 = arith.constant 1.000000e+00 : f32
    %28 = vector.broadcast %cst_20 : f32 to vector<2x32xf32>
    %29 = arith.addf %28, %27 : vector<2x32xf32>
    %30 = arith.divf %28, %29 : vector<2x32xf32>
    %31 = vector.extract_strided_slice %24 {offsets = [0, 32], sizes = [2, 32], strides = [1, 1]} : vector<2x128xf32> to vector<2x32xf32>
    %32 = arith.negf %31 : vector<2x32xf32>
    %33 = math.exp %32 : vector<2x32xf32>
    %cst_21 = arith.constant 1.000000e+00 : f32
    %34 = vector.broadcast %cst_21 : f32 to vector<2x32xf32>
    %35 = arith.addf %34, %33 : vector<2x32xf32>
    %36 = arith.divf %34, %35 : vector<2x32xf32>
    %37 = vector.extract_strided_slice %24 {offsets = [0, 64], sizes = [2, 32], strides = [1, 1]} : vector<2x128xf32> to vector<2x32xf32>
    %38 = math.tanh %37 : vector<2x32xf32>
    %39 = vector.extract_strided_slice %24 {offsets = [0, 96], sizes = [2, 32], strides = [1, 1]} : vector<2x128xf32> to vector<2x32xf32>
    %40 = arith.negf %39 : vector<2x32xf32>
    %41 = math.exp %40 : vector<2x32xf32>
    %cst_22 = arith.constant 1.000000e+00 : f32
    %42 = vector.broadcast %cst_22 : f32 to vector<2x32xf32>
    %43 = arith.addf %42, %41 : vector<2x32xf32>
    %44 = arith.divf %42, %43 : vector<2x32xf32>
    %45 = arith.mulf %36, %10 : vector<2x32xf32>
    %46 = arith.mulf %30, %38 : vector<2x32xf32>
    %47 = arith.addf %45, %46 : vector<2x32xf32>
    %48 = math.tanh %47 : vector<2x32xf32>
    %49 = arith.mulf %44, %48 : vector<2x32xf32>
    %50 = arith.index_cast %15 : i32 to index
    %c0_23 = arith.constant 0 : index
    %c0_24 = arith.constant 0 : index
    %51 = vector.load %arg3[%50, %c0_23, %c0_24] : memref<8x2x128xbf16, #tpu.memory_space<vmem>>, vector<1x2x128xbf16>
    %52 = vector.shape_cast %51 : vector<1x2x128xbf16> to vector<2x128xbf16>
    %53 = arith.extf %52 : vector<2x128xbf16> to vector<2x128xf32>
    %54 = vector.broadcast %6 : vector<1x128xf32> to vector<2x128xf32>
    %55 = arith.addf %53, %54 : vector<2x128xf32>
    %56 = arith.truncf %12 : vector<2x32xf32> to vector<2x32xbf16>
    %cst_25 = arith.constant dense<0.000000e+00> : vector<2x128xf32>
    %57 = tpu.matmul %56, %4, %cst_25 {dimension_numbers = #tpu.dot_dimension_numbers<[1], [0], [0], [1], [0, 0, 1, 1], [], []>} : vector<2x32xbf16>, vector<32x128xbf16>, vector<2x128xf32> -> vector<2x128xf32>
    %58 = arith.addf %55, %57 : vector<2x128xf32>
    %59 = vector.extract_strided_slice %58 {offsets = [0, 0], sizes = [2, 32], strides = [1, 1]} : vector<2x128xf32> to vector<2x32xf32>
    %60 = arith.negf %59 : vector<2x32xf32>
    %61 = math.exp %60 : vector<2x32xf32>
    %cst_26 = arith.constant 1.000000e+00 : f32
    %62 = vector.broadcast %cst_26 : f32 to vector<2x32xf32>
    %63 = arith.addf %62, %61 : vector<2x32xf32>
    %64 = arith.divf %62, %63 : vector<2x32xf32>
    %65 = vector.extract_strided_slice %58 {offsets = [0, 32], sizes = [2, 32], strides = [1, 1]} : vector<2x128xf32> to vector<2x32xf32>
    %66 = arith.negf %65 : vector<2x32xf32>
    %67 = math.exp %66 : vector<2x32xf32>
    %cst_27 = arith.constant 1.000000e+00 : f32
    %68 = vector.broadcast %cst_27 : f32 to vector<2x32xf32>
    %69 = arith.addf %68, %67 : vector<2x32xf32>
    %70 = arith.divf %68, %69 : vector<2x32xf32>
    %71 = vector.extract_strided_slice %58 {offsets = [0, 64], sizes = [2, 32], strides = [1, 1]} : vector<2x128xf32> to vector<2x32xf32>
    %72 = math.tanh %71 : vector<2x32xf32>
    %73 = vector.extract_strided_slice %58 {offsets = [0, 96], sizes = [2, 32], strides = [1, 1]} : vector<2x128xf32> to vector<2x32xf32>
    %74 = arith.negf %73 : vector<2x32xf32>
    %75 = math.exp %74 : vector<2x32xf32>
    %cst_28 = arith.constant 1.000000e+00 : f32
    %76 = vector.broadcast %cst_28 : f32 to vector<2x32xf32>
    %77 = arith.addf %76, %75 : vector<2x32xf32>
    %78 = arith.divf %76, %77 : vector<2x32xf32>
    %79 = arith.mulf %70, %14 : vector<2x32xf32>
    %80 = arith.mulf %64, %72 : vector<2x32xf32>
    %81 = arith.addf %79, %80 : vector<2x32xf32>
    %82 = math.tanh %81 : vector<2x32xf32>
    %83 = arith.mulf %78, %82 : vector<2x32xf32>
    %84 = arith.index_cast %c0_i32_17 : i32 to index
    %c0_29 = arith.constant 0 : index
    %c0_30 = arith.constant 0 : index
    %85 = vector.load %arg8[%84, %c0_29, %c0_30] : memref<8x2x32xf32, #tpu.memory_space<vmem>>, vector<1x2x32xf32>
    %86 = vector.shape_cast %85 : vector<1x2x32xf32> to vector<2x32xf32>
    %87 = vector.shape_cast %49 : vector<2x32xf32> to vector<1x2x32xf32>
    tpu.vector_store %arg8[%84, %c0_29, %c0_30], %87 {strides = array<i32>} : memref<8x2x32xf32, #tpu.memory_space<vmem>>, vector<1x2x32xf32>,
    %88 = arith.index_cast %15 : i32 to index
    %c0_31 = arith.constant 0 : index
    %c0_32 = arith.constant 0 : index
    %89 = vector.load %arg9[%88, %c0_31, %c0_32] : memref<8x2x32xf32, #tpu.memory_space<vmem>>, vector<1x2x32xf32>
    %90 = vector.shape_cast %89 : vector<1x2x32xf32> to vector<2x32xf32>
    %91 = vector.shape_cast %83 : vector<2x32xf32> to vector<1x2x32xf32>
    tpu.vector_store %arg9[%88, %c0_31, %c0_32], %91 {strides = array<i32>} : memref<8x2x32xf32, #tpu.memory_space<vmem>>, vector<1x2x32xf32>,
    %c1_i32 = arith.constant 1 : i32
    %c7_i32_33 = arith.constant 7 : i32
    %92 = arith.subi %c7_i32_33, %c1_i32 : i32
    %93 = arith.index_cast %c1_i32 : i32 to index
    %c0_34 = arith.constant 0 : index
    %c0_35 = arith.constant 0 : index
    %94 = vector.load %arg2[%93, %c0_34, %c0_35] : memref<8x2x128xbf16, #tpu.memory_space<vmem>>, vector<1x2x128xbf16>
    %95 = vector.shape_cast %94 : vector<1x2x128xbf16> to vector<2x128xbf16>
    %96 = arith.extf %95 : vector<2x128xbf16> to vector<2x128xf32>
    %97 = vector.broadcast %5 : vector<1x128xf32> to vector<2x128xf32>
    %98 = arith.addf %96, %97 : vector<2x128xf32>
    %99 = arith.truncf %49 : vector<2x32xf32> to vector<2x32xbf16>
    %cst_36 = arith.constant dense<0.000000e+00> : vector<2x128xf32>
    %100 = tpu.matmul %99, %3, %cst_36 {dimension_numbers = #tpu.dot_dimension_numbers<[1], [0], [0], [1], [0, 0, 1, 1], [], []>} : vector<2x32xbf16>, vector<32x128xbf16>, vector<2x128xf32> -> vector<2x128xf32>
    %101 = arith.addf %98, %100 : vector<2x128xf32>
    %102 = vector.extract_strided_slice %101 {offsets = [0, 0], sizes = [2, 32], strides = [1, 1]} : vector<2x128xf32> to vector<2x32xf32>
    %103 = arith.negf %102 : vector<2x32xf32>
    %104 = math.exp %103 : vector<2x32xf32>
    %cst_37 = arith.constant 1.000000e+00 : f32
    %105 = vector.broadcast %cst_37 : f32 to vector<2x32xf32>
    %106 = arith.addf %105, %104 : vector<2x32xf32>
    %107 = arith.divf %105, %106 : vector<2x32xf32>
    %108 = vector.extract_strided_slice %101 {offsets = [0, 32], sizes = [2, 32], strides = [1, 1]} : vector<2x128xf32> to vector<2x32xf32>
    %109 = arith.negf %108 : vector<2x32xf32>
    %110 = math.exp %109 : vector<2x32xf32>
    %cst_38 = arith.constant 1.000000e+00 : f32
    %111 = vector.broadcast %cst_38 : f32 to vector<2x32xf32>
    %112 = arith.addf %111, %110 : vector<2x32xf32>
    %113 = arith.divf %111, %112 : vector<2x32xf32>
    %114 = vector.extract_strided_slice %101 {offsets = [0, 64], sizes = [2, 32], strides = [1, 1]} : vector<2x128xf32> to vector<2x32xf32>
    %115 = math.tanh %114 : vector<2x32xf32>
    %116 = vector.extract_strided_slice %101 {offsets = [0, 96], sizes = [2, 32], strides = [1, 1]} : vector<2x128xf32> to vector<2x32xf32>
    %117 = arith.negf %116 : vector<2x32xf32>
    %118 = math.exp %117 : vector<2x32xf32>
    %cst_39 = arith.constant 1.000000e+00 : f32
    %119 = vector.broadcast %cst_39 : f32 to vector<2x32xf32>
    %120 = arith.addf %119, %118 : vector<2x32xf32>
    %121 = arith.divf %119, %120 : vector<2x32xf32>
    %122 = arith.mulf %113, %47 : vector<2x32xf32>
    %123 = arith.mulf %107, %115 : vector<2x32xf32>
    %124 = arith.addf %122, %123 : vector<2x32xf32>
    %125 = math.tanh %124 : vector<2x32xf32>
    %126 = arith.mulf %121, %125 : vector<2x32xf32>
    %127 = arith.index_cast %92 : i32 to index
    %c0_40 = arith.constant 0 : index
    %c0_41 = arith.constant 0 : index
    %128 = vector.load %arg3[%127, %c0_40, %c0_41] : memref<8x2x128xbf16, #tpu.memory_space<vmem>>, vector<1x2x128xbf16>
    %129 = vector.shape_cast %128 : vector<1x2x128xbf16> to vector<2x128xbf16>
    %130 = arith.extf %129 : vector<2x128xbf16> to vector<2x128xf32>
    %131 = vector.broadcast %6 : vector<1x128xf32> to vector<2x128xf32>
    %132 = arith.addf %130, %131 : vector<2x128xf32>
    %133 = arith.truncf %83 : vector<2x32xf32> to vector<2x32xbf16>
    %cst_42 = arith.constant dense<0.000000e+00> : vector<2x128xf32>
    %134 = tpu.matmul %133, %4, %cst_42 {dimension_numbers = #tpu.dot_dimension_numbers<[1], [0], [0], [1], [0, 0, 1, 1], [], []>} : vector<2x32xbf16>, vector<32x128xbf16>, vector<2x128xf32> -> vector<2x128xf32>
    %135 = arith.addf %132, %134 : vector<2x128xf32>
    %136 = vector.extract_strided_slice %135 {offsets = [0, 0], sizes = [2, 32], strides = [1, 1]} : vector<2x128xf32> to vector<2x32xf32>
    %137 = arith.negf %136 : vector<2x32xf32>
    %138 = math.exp %137 : vector<2x32xf32>
    %cst_43 = arith.constant 1.000000e+00 : f32
    %139 = vector.broadcast %cst_43 : f32 to vector<2x32xf32>
    %140 = arith.addf %139, %138 : vector<2x32xf32>
    %141 = arith.divf %139, %140 : vector<2x32xf32>
    %142 = vector.extract_strided_slice %135 {offsets = [0, 32], sizes = [2, 32], strides = [1, 1]} : vector<2x128xf32> to vector<2x32xf32>
    %143 = arith.negf %142 : vector<2x32xf32>
    %144 = math.exp %143 : vector<2x32xf32>
    %cst_44 = arith.constant 1.000000e+00 : f32
    %145 = vector.broadcast %cst_44 : f32 to vector<2x32xf32>
    %146 = arith.addf %145, %144 : vector<2x32xf32>
    %147 = arith.divf %145, %146 : vector<2x32xf32>
    %148 = vector.extract_strided_slice %135 {offsets = [0, 64], sizes = [2, 32], strides = [1, 1]} : vector<2x128xf32> to vector<2x32xf32>
    %149 = math.tanh %148 : vector<2x32xf32>
    %150 = vector.extract_strided_slice %135 {offsets = [0, 96], sizes = [2, 32], strides = [1, 1]} : vector<2x128xf32> to vector<2x32xf32>
    %151 = arith.negf %150 : vector<2x32xf32>
    %152 = math.exp %151 : vector<2x32xf32>
    %cst_45 = arith.constant 1.000000e+00 : f32
    %153 = vector.broadcast %cst_45 : f32 to vector<2x32xf32>
    %154 = arith.addf %153, %152 : vector<2x32xf32>
    %155 = arith.divf %153, %154 : vector<2x32xf32>
    %156 = arith.mulf %147, %81 : vector<2x32xf32>
    %157 = arith.mulf %141, %149 : vector<2x32xf32>
    %158 = arith.addf %156, %157 : vector<2x32xf32>
    %159 = math.tanh %158 : vector<2x32xf32>
    %160 = arith.mulf %155, %159 : vector<2x32xf32>
    %161 = arith.index_cast %c1_i32 : i32 to index
    %c0_46 = arith.constant 0 : index
    %c0_47 = arith.constant 0 : index
    %162 = vector.load %arg8[%161, %c0_46, %c0_47] : memref<8x2x32xf32, #tpu.memory_space<vmem>>, vector<1x2x32xf32>
    %163 = vector.shape_cast %162 : vector<1x2x32xf32> to vector<2x32xf32>
    %164 = vector.shape_cast %126 : vector<2x32xf32> to vector<1x2x32xf32>
    tpu.vector_store %arg8[%161, %c0_46, %c0_47], %164 {strides = array<i32>} : memref<8x2x32xf32, #tpu.memory_space<vmem>>, vector<1x2x32xf32>,
    %165 = arith.index_cast %92 : i32 to index
    %c0_48 = arith.constant 0 : index
    %c0_49 = arith.constant 0 : index
    %166 = vector.load %arg9[%165, %c0_48, %c0_49] : memref<8x2x32xf32, #tpu.memory_space<vmem>>, vector<1x2x32xf32>
    %167 = vector.shape_cast %166 : vector<1x2x32xf32> to vector<2x32xf32>
    %168 = vector.shape_cast %160 : vector<2x32xf32> to vector<1x2x32xf32>
    tpu.vector_store %arg9[%165, %c0_48, %c0_49], %168 {strides = array<i32>} : memref<8x2x32xf32, #tpu.memory_space<vmem>>, vector<1x2x32xf32>,
    %c2_i32 = arith.constant 2 : i32
    %c7_i32_50 = arith.constant 7 : i32
    %169 = arith.subi %c7_i32_50, %c2_i32 : i32
    %170 = arith.index_cast %c2_i32 : i32 to index
    %c0_51 = arith.constant 0 : index
    %c0_52 = arith.constant 0 : index
    %171 = vector.load %arg2[%170, %c0_51, %c0_52] : memref<8x2x128xbf16, #tpu.memory_space<vmem>>, vector<1x2x128xbf16>
    %172 = vector.shape_cast %171 : vector<1x2x128xbf16> to vector<2x128xbf16>
    %173 = arith.extf %172 : vector<2x128xbf16> to vector<2x128xf32>
    %174 = vector.broadcast %5 : vector<1x128xf32> to vector<2x128xf32>
    %175 = arith.addf %173, %174 : vector<2x128xf32>
    %176 = arith.truncf %126 : vector<2x32xf32> to vector<2x32xbf16>
    %cst_53 = arith.constant dense<0.000000e+00> : vector<2x128xf32>
    %177 = tpu.matmul %176, %3, %cst_53 {dimension_numbers = #tpu.dot_dimension_numbers<[1], [0], [0], [1], [0, 0, 1, 1], [], []>} : vector<2x32xbf16>, vector<32x128xbf16>, vector<2x128xf32> -> vector<2x128xf32>
    %178 = arith.addf %175, %177 : vector<2x128xf32>
    %179 = vector.extract_strided_slice %178 {offsets = [0, 0], sizes = [2, 32], strides = [1, 1]} : vector<2x128xf32> to vector<2x32xf32>
    %180 = arith.negf %179 : vector<2x32xf32>
    %181 = math.exp %180 : vector<2x32xf32>
    %cst_54 = arith.constant 1.000000e+00 : f32
    %182 = vector.broadcast %cst_54 : f32 to vector<2x32xf32>
    %183 = arith.addf %182, %181 : vector<2x32xf32>
    %184 = arith.divf %182, %183 : vector<2x32xf32>
    %185 = vector.extract_strided_slice %178 {offsets = [0, 32], sizes = [2, 32], strides = [1, 1]} : vector<2x128xf32> to vector<2x32xf32>
    %186 = arith.negf %185 : vector<2x32xf32>
    %187 = math.exp %186 : vector<2x32xf32>
    %cst_55 = arith.constant 1.000000e+00 : f32
    %188 = vector.broadcast %cst_55 : f32 to vector<2x32xf32>
    %189 = arith.addf %188, %187 : vector<2x32xf32>
    %190 = arith.divf %188, %189 : vector<2x32xf32>
    %191 = vector.extract_strided_slice %178 {offsets = [0, 64], sizes = [2, 32], strides = [1, 1]} : vector<2x128xf32> to vector<2x32xf32>
    %192 = math.tanh %191 : vector<2x32xf32>
    %193 = vector.extract_strided_slice %178 {offsets = [0, 96], sizes = [2, 32], strides = [1, 1]} : vector<2x128xf32> to vector<2x32xf32>
    %194 = arith.negf %193 : vector<2x32xf32>
    %195 = math.exp %194 : vector<2x32xf32>
    %cst_56 = arith.constant 1.000000e+00 : f32
    %196 = vector.broadcast %cst_56 : f32 to vector<2x32xf32>
    %197 = arith.addf %196, %195 : vector<2x32xf32>
    %198 = arith.divf %196, %197 : vector<2x32xf32>
    %199 = arith.mulf %190, %124 : vector<2x32xf32>
    %200 = arith.mulf %184, %192 : vector<2x32xf32>
    %201 = arith.addf %199, %200 : vector<2x32xf32>
    %202 = math.tanh %201 : vector<2x32xf32>
    %203 = arith.mulf %198, %202 : vector<2x32xf32>
    %204 = arith.index_cast %169 : i32 to index
    %c0_57 = arith.constant 0 : index
    %c0_58 = arith.constant 0 : index
    %205 = vector.load %arg3[%204, %c0_57, %c0_58] : memref<8x2x128xbf16, #tpu.memory_space<vmem>>, vector<1x2x128xbf16>
    %206 = vector.shape_cast %205 : vector<1x2x128xbf16> to vector<2x128xbf16>
    %207 = arith.extf %206 : vector<2x128xbf16> to vector<2x128xf32>
    %208 = vector.broadcast %6 : vector<1x128xf32> to vector<2x128xf32>
    %209 = arith.addf %207, %208 : vector<2x128xf32>
    %210 = arith.truncf %160 : vector<2x32xf32> to vector<2x32xbf16>
    %cst_59 = arith.constant dense<0.000000e+00> : vector<2x128xf32>
    %211 = tpu.matmul %210, %4, %cst_59 {dimension_numbers = #tpu.dot_dimension_numbers<[1], [0], [0], [1], [0, 0, 1, 1], [], []>} : vector<2x32xbf16>, vector<32x128xbf16>, vector<2x128xf32> -> vector<2x128xf32>
    %212 = arith.addf %209, %211 : vector<2x128xf32>
    %213 = vector.extract_strided_slice %212 {offsets = [0, 0], sizes = [2, 32], strides = [1, 1]} : vector<2x128xf32> to vector<2x32xf32>
    %214 = arith.negf %213 : vector<2x32xf32>
    %215 = math.exp %214 : vector<2x32xf32>
    %cst_60 = arith.constant 1.000000e+00 : f32
    %216 = vector.broadcast %cst_60 : f32 to vector<2x32xf32>
    %217 = arith.addf %216, %215 : vector<2x32xf32>
    %218 = arith.divf %216, %217 : vector<2x32xf32>
    %219 = vector.extract_strided_slice %212 {offsets = [0, 32], sizes = [2, 32], strides = [1, 1]} : vector<2x128xf32> to vector<2x32xf32>
    %220 = arith.negf %219 : vector<2x32xf32>
    %221 = math.exp %220 : vector<2x32xf32>
    %cst_61 = arith.constant 1.000000e+00 : f32
    %222 = vector.broadcast %cst_61 : f32 to vector<2x32xf32>
    %223 = arith.addf %222, %221 : vector<2x32xf32>
    %224 = arith.divf %222, %223 : vector<2x32xf32>
    %225 = vector.extract_strided_slice %212 {offsets = [0, 64], sizes = [2, 32], strides = [1, 1]} : vector<2x128xf32> to vector<2x32xf32>
    %226 = math.tanh %225 : vector<2x32xf32>
    %227 = vector.extract_strided_slice %212 {offsets = [0, 96], sizes = [2, 32], strides = [1, 1]} : vector<2x128xf32> to vector<2x32xf32>
    %228 = arith.negf %227 : vector<2x32xf32>
    %229 = math.exp %228 : vector<2x32xf32>
    %cst_62 = arith.constant 1.000000e+00 : f32
    %230 = vector.broadcast %cst_62 : f32 to vector<2x32xf32>
    %231 = arith.addf %230, %229 : vector<2x32xf32>
    %232 = arith.divf %230, %231 : vector<2x32xf32>
    %233 = arith.mulf %224, %158 : vector<2x32xf32>
    %234 = arith.mulf %218, %226 : vector<2x32xf32>
    %235 = arith.addf %233, %234 : vector<2x32xf32>
    %236 = math.tanh %235 : vector<2x32xf32>
    %237 = arith.mulf %232, %236 : vector<2x32xf32>
    %238 = arith.index_cast %c2_i32 : i32 to index
    %c0_63 = arith.constant 0 : index
    %c0_64 = arith.constant 0 : index
    %239 = vector.load %arg8[%238, %c0_63, %c0_64] : memref<8x2x32xf32, #tpu.memory_space<vmem>>, vector<1x2x32xf32>
    %240 = vector.shape_cast %239 : vector<1x2x32xf32> to vector<2x32xf32>
    %241 = vector.shape_cast %203 : vector<2x32xf32> to vector<1x2x32xf32>
    tpu.vector_store %arg8[%238, %c0_63, %c0_64], %241 {strides = array<i32>} : memref<8x2x32xf32, #tpu.memory_space<vmem>>, vector<1x2x32xf32>,
    %242 = arith.index_cast %169 : i32 to index
    %c0_65 = arith.constant 0 : index
    %c0_66 = arith.constant 0 : index
    %243 = vector.load %arg9[%242, %c0_65, %c0_66] : memref<8x2x32xf32, #tpu.memory_space<vmem>>, vector<1x2x32xf32>
    %244 = vector.shape_cast %243 : vector<1x2x32xf32> to vector<2x32xf32>
    %245 = vector.shape_cast %237 : vector<2x32xf32> to vector<1x2x32xf32>
    tpu.vector_store %arg9[%242, %c0_65, %c0_66], %245 {strides = array<i32>} : memref<8x2x32xf32, #tpu.memory_space<vmem>>, vector<1x2x32xf32>,
    %c3_i32 = arith.constant 3 : i32
    %c7_i32_67 = arith.constant 7 : i32
    %246 = arith.subi %c7_i32_67, %c3_i32 : i32
    %247 = arith.index_cast %c3_i32 : i32 to index
    %c0_68 = arith.constant 0 : index
    %c0_69 = arith.constant 0 : index
    %248 = vector.load %arg2[%247, %c0_68, %c0_69] : memref<8x2x128xbf16, #tpu.memory_space<vmem>>, vector<1x2x128xbf16>
    %249 = vector.shape_cast %248 : vector<1x2x128xbf16> to vector<2x128xbf16>
    %250 = arith.extf %249 : vector<2x128xbf16> to vector<2x128xf32>
    %251 = vector.broadcast %5 : vector<1x128xf32> to vector<2x128xf32>
    %252 = arith.addf %250, %251 : vector<2x128xf32>
    %253 = arith.truncf %203 : vector<2x32xf32> to vector<2x32xbf16>
    %cst_70 = arith.constant dense<0.000000e+00> : vector<2x128xf32>
    %254 = tpu.matmul %253, %3, %cst_70 {dimension_numbers = #tpu.dot_dimension_numbers<[1], [0], [0], [1], [0, 0, 1, 1], [], []>} : vector<2x32xbf16>, vector<32x128xbf16>, vector<2x128xf32> -> vector<2x128xf32>
    %255 = arith.addf %252, %254 : vector<2x128xf32>
    %256 = vector.extract_strided_slice %255 {offsets = [0, 0], sizes = [2, 32], strides = [1, 1]} : vector<2x128xf32> to vector<2x32xf32>
    %257 = arith.negf %256 : vector<2x32xf32>
    %258 = math.exp %257 : vector<2x32xf32>
    %cst_71 = arith.constant 1.000000e+00 : f32
    %259 = vector.broadcast %cst_71 : f32 to vector<2x32xf32>
    %260 = arith.addf %259, %258 : vector<2x32xf32>
    %261 = arith.divf %259, %260 : vector<2x32xf32>
    %262 = vector.extract_strided_slice %255 {offsets = [0, 32], sizes = [2, 32], strides = [1, 1]} : vector<2x128xf32> to vector<2x32xf32>
    %263 = arith.negf %262 : vector<2x32xf32>
    %264 = math.exp %263 : vector<2x32xf32>
    %cst_72 = arith.constant 1.000000e+00 : f32
    %265 = vector.broadcast %cst_72 : f32 to vector<2x32xf32>
    %266 = arith.addf %265, %264 : vector<2x32xf32>
    %267 = arith.divf %265, %266 : vector<2x32xf32>
    %268 = vector.extract_strided_slice %255 {offsets = [0, 64], sizes = [2, 32], strides = [1, 1]} : vector<2x128xf32> to vector<2x32xf32>
    %269 = math.tanh %268 : vector<2x32xf32>
    %270 = vector.extract_strided_slice %255 {offsets = [0, 96], sizes = [2, 32], strides = [1, 1]} : vector<2x128xf32> to vector<2x32xf32>
    %271 = arith.negf %270 : vector<2x32xf32>
    %272 = math.exp %271 : vector<2x32xf32>
    %cst_73 = arith.constant 1.000000e+00 : f32
    %273 = vector.broadcast %cst_73 : f32 to vector<2x32xf32>
    %274 = arith.addf %273, %272 : vector<2x32xf32>
    %275 = arith.divf %273, %274 : vector<2x32xf32>
    %276 = arith.mulf %267, %201 : vector<2x32xf32>
    %277 = arith.mulf %261, %269 : vector<2x32xf32>
    %278 = arith.addf %276, %277 : vector<2x32xf32>
    %279 = math.tanh %278 : vector<2x32xf32>
    %280 = arith.mulf %275, %279 : vector<2x32xf32>
    %281 = arith.index_cast %246 : i32 to index
    %c0_74 = arith.constant 0 : index
    %c0_75 = arith.constant 0 : index
    %282 = vector.load %arg3[%281, %c0_74, %c0_75] : memref<8x2x128xbf16, #tpu.memory_space<vmem>>, vector<1x2x128xbf16>
    %283 = vector.shape_cast %282 : vector<1x2x128xbf16> to vector<2x128xbf16>
    %284 = arith.extf %283 : vector<2x128xbf16> to vector<2x128xf32>
    %285 = vector.broadcast %6 : vector<1x128xf32> to vector<2x128xf32>
    %286 = arith.addf %284, %285 : vector<2x128xf32>
    %287 = arith.truncf %237 : vector<2x32xf32> to vector<2x32xbf16>
    %cst_76 = arith.constant dense<0.000000e+00> : vector<2x128xf32>
    %288 = tpu.matmul %287, %4, %cst_76 {dimension_numbers = #tpu.dot_dimension_numbers<[1], [0], [0], [1], [0, 0, 1, 1], [], []>} : vector<2x32xbf16>, vector<32x128xbf16>, vector<2x128xf32> -> vector<2x128xf32>
    %289 = arith.addf %286, %288 : vector<2x128xf32>
    %290 = vector.extract_strided_slice %289 {offsets = [0, 0], sizes = [2, 32], strides = [1, 1]} : vector<2x128xf32> to vector<2x32xf32>
    %291 = arith.negf %290 : vector<2x32xf32>
    %292 = math.exp %291 : vector<2x32xf32>
    %cst_77 = arith.constant 1.000000e+00 : f32
    %293 = vector.broadcast %cst_77 : f32 to vector<2x32xf32>
    %294 = arith.addf %293, %292 : vector<2x32xf32>
    %295 = arith.divf %293, %294 : vector<2x32xf32>
    %296 = vector.extract_strided_slice %289 {offsets = [0, 32], sizes = [2, 32], strides = [1, 1]} : vector<2x128xf32> to vector<2x32xf32>
    %297 = arith.negf %296 : vector<2x32xf32>
    %298 = math.exp %297 : vector<2x32xf32>
    %cst_78 = arith.constant 1.000000e+00 : f32
    %299 = vector.broadcast %cst_78 : f32 to vector<2x32xf32>
    %300 = arith.addf %299, %298 : vector<2x32xf32>
    %301 = arith.divf %299, %300 : vector<2x32xf32>
    %302 = vector.extract_strided_slice %289 {offsets = [0, 64], sizes = [2, 32], strides = [1, 1]} : vector<2x128xf32> to vector<2x32xf32>
    %303 = math.tanh %302 : vector<2x32xf32>
    %304 = vector.extract_strided_slice %289 {offsets = [0, 96], sizes = [2, 32], strides = [1, 1]} : vector<2x128xf32> to vector<2x32xf32>
    %305 = arith.negf %304 : vector<2x32xf32>
    %306 = math.exp %305 : vector<2x32xf32>
    %cst_79 = arith.constant 1.000000e+00 : f32
    %307 = vector.broadcast %cst_79 : f32 to vector<2x32xf32>
    %308 = arith.addf %307, %306 : vector<2x32xf32>
    %309 = arith.divf %307, %308 : vector<2x32xf32>
    %310 = arith.mulf %301, %235 : vector<2x32xf32>
    %311 = arith.mulf %295, %303 : vector<2x32xf32>
    %312 = arith.addf %310, %311 : vector<2x32xf32>
    %313 = math.tanh %312 : vector<2x32xf32>
    %314 = arith.mulf %309, %313 : vector<2x32xf32>
    %315 = arith.index_cast %c3_i32 : i32 to index
    %c0_80 = arith.constant 0 : index
    %c0_81 = arith.constant 0 : index
    %316 = vector.load %arg8[%315, %c0_80, %c0_81] : memref<8x2x32xf32, #tpu.memory_space<vmem>>, vector<1x2x32xf32>
    %317 = vector.shape_cast %316 : vector<1x2x32xf32> to vector<2x32xf32>
    %318 = vector.shape_cast %280 : vector<2x32xf32> to vector<1x2x32xf32>
    tpu.vector_store %arg8[%315, %c0_80, %c0_81], %318 {strides = array<i32>} : memref<8x2x32xf32, #tpu.memory_space<vmem>>, vector<1x2x32xf32>,
    %319 = arith.index_cast %246 : i32 to index
    %c0_82 = arith.constant 0 : index
    %c0_83 = arith.constant 0 : index
    %320 = vector.load %arg9[%319, %c0_82, %c0_83] : memref<8x2x32xf32, #tpu.memory_space<vmem>>, vector<1x2x32xf32>
    %321 = vector.shape_cast %320 : vector<1x2x32xf32> to vector<2x32xf32>
    %322 = vector.shape_cast %314 : vector<2x32xf32> to vector<1x2x32xf32>
    tpu.vector_store %arg9[%319, %c0_82, %c0_83], %322 {strides = array<i32>} : memref<8x2x32xf32, #tpu.memory_space<vmem>>, vector<1x2x32xf32>,
    %c4_i32 = arith.constant 4 : i32
    %c7_i32_84 = arith.constant 7 : i32
    %323 = arith.subi %c7_i32_84, %c4_i32 : i32
    %324 = arith.index_cast %c4_i32 : i32 to index
    %c0_85 = arith.constant 0 : index
    %c0_86 = arith.constant 0 : index
    %325 = vector.load %arg2[%324, %c0_85, %c0_86] : memref<8x2x128xbf16, #tpu.memory_space<vmem>>, vector<1x2x128xbf16>
    %326 = vector.shape_cast %325 : vector<1x2x128xbf16> to vector<2x128xbf16>
    %327 = arith.extf %326 : vector<2x128xbf16> to vector<2x128xf32>
    %328 = vector.broadcast %5 : vector<1x128xf32> to vector<2x128xf32>
    %329 = arith.addf %327, %328 : vector<2x128xf32>
    %330 = arith.truncf %280 : vector<2x32xf32> to vector<2x32xbf16>
    %cst_87 = arith.constant dense<0.000000e+00> : vector<2x128xf32>
    %331 = tpu.matmul %330, %3, %cst_87 {dimension_numbers = #tpu.dot_dimension_numbers<[1], [0], [0], [1], [0, 0, 1, 1], [], []>} : vector<2x32xbf16>, vector<32x128xbf16>, vector<2x128xf32> -> vector<2x128xf32>
    %332 = arith.addf %329, %331 : vector<2x128xf32>
    %333 = vector.extract_strided_slice %332 {offsets = [0, 0], sizes = [2, 32], strides = [1, 1]} : vector<2x128xf32> to vector<2x32xf32>
    %334 = arith.negf %333 : vector<2x32xf32>
    %335 = math.exp %334 : vector<2x32xf32>
    %cst_88 = arith.constant 1.000000e+00 : f32
    %336 = vector.broadcast %cst_88 : f32 to vector<2x32xf32>
    %337 = arith.addf %336, %335 : vector<2x32xf32>
    %338 = arith.divf %336, %337 : vector<2x32xf32>
    %339 = vector.extract_strided_slice %332 {offsets = [0, 32], sizes = [2, 32], strides = [1, 1]} : vector<2x128xf32> to vector<2x32xf32>
    %340 = arith.negf %339 : vector<2x32xf32>
    %341 = math.exp %340 : vector<2x32xf32>
    %cst_89 = arith.constant 1.000000e+00 : f32
    %342 = vector.broadcast %cst_89 : f32 to vector<2x32xf32>
    %343 = arith.addf %342, %341 : vector<2x32xf32>
    %344 = arith.divf %342, %343 : vector<2x32xf32>
    %345 = vector.extract_strided_slice %332 {offsets = [0, 64], sizes = [2, 32], strides = [1, 1]} : vector<2x128xf32> to vector<2x32xf32>
    %346 = math.tanh %345 : vector<2x32xf32>
    %347 = vector.extract_strided_slice %332 {offsets = [0, 96], sizes = [2, 32], strides = [1, 1]} : vector<2x128xf32> to vector<2x32xf32>
    %348 = arith.negf %347 : vector<2x32xf32>
    %349 = math.exp %348 : vector<2x32xf32>
    %cst_90 = arith.constant 1.000000e+00 : f32
    %350 = vector.broadcast %cst_90 : f32 to vector<2x32xf32>
    %351 = arith.addf %350, %349 : vector<2x32xf32>
    %352 = arith.divf %350, %351 : vector<2x32xf32>
    %353 = arith.mulf %344, %278 : vector<2x32xf32>
    %354 = arith.mulf %338, %346 : vector<2x32xf32>
    %355 = arith.addf %353, %354 : vector<2x32xf32>
    %356 = math.tanh %355 : vector<2x32xf32>
    %357 = arith.mulf %352, %356 : vector<2x32xf32>
    %358 = arith.index_cast %323 : i32 to index
    %c0_91 = arith.constant 0 : index
    %c0_92 = arith.constant 0 : index
    %359 = vector.load %arg3[%358, %c0_91, %c0_92] : memref<8x2x128xbf16, #tpu.memory_space<vmem>>, vector<1x2x128xbf16>
    %360 = vector.shape_cast %359 : vector<1x2x128xbf16> to vector<2x128xbf16>
    %361 = arith.extf %360 : vector<2x128xbf16> to vector<2x128xf32>
    %362 = vector.broadcast %6 : vector<1x128xf32> to vector<2x128xf32>
    %363 = arith.addf %361, %362 : vector<2x128xf32>
    %364 = arith.truncf %314 : vector<2x32xf32> to vector<2x32xbf16>
    %cst_93 = arith.constant dense<0.000000e+00> : vector<2x128xf32>
    %365 = tpu.matmul %364, %4, %cst_93 {dimension_numbers = #tpu.dot_dimension_numbers<[1], [0], [0], [1], [0, 0, 1, 1], [], []>} : vector<2x32xbf16>, vector<32x128xbf16>, vector<2x128xf32> -> vector<2x128xf32>
    %366 = arith.addf %363, %365 : vector<2x128xf32>
    %367 = vector.extract_strided_slice %366 {offsets = [0, 0], sizes = [2, 32], strides = [1, 1]} : vector<2x128xf32> to vector<2x32xf32>
    %368 = arith.negf %367 : vector<2x32xf32>
    %369 = math.exp %368 : vector<2x32xf32>
    %cst_94 = arith.constant 1.000000e+00 : f32
    %370 = vector.broadcast %cst_94 : f32 to vector<2x32xf32>
    %371 = arith.addf %370, %369 : vector<2x32xf32>
    %372 = arith.divf %370, %371 : vector<2x32xf32>
    %373 = vector.extract_strided_slice %366 {offsets = [0, 32], sizes = [2, 32], strides = [1, 1]} : vector<2x128xf32> to vector<2x32xf32>
    %374 = arith.negf %373 : vector<2x32xf32>
    %375 = math.exp %374 : vector<2x32xf32>
    %cst_95 = arith.constant 1.000000e+00 : f32
    %376 = vector.broadcast %cst_95 : f32 to vector<2x32xf32>
    %377 = arith.addf %376, %375 : vector<2x32xf32>
    %378 = arith.divf %376, %377 : vector<2x32xf32>
    %379 = vector.extract_strided_slice %366 {offsets = [0, 64], sizes = [2, 32], strides = [1, 1]} : vector<2x128xf32> to vector<2x32xf32>
    %380 = math.tanh %379 : vector<2x32xf32>
    %381 = vector.extract_strided_slice %366 {offsets = [0, 96], sizes = [2, 32], strides = [1, 1]} : vector<2x128xf32> to vector<2x32xf32>
    %382 = arith.negf %381 : vector<2x32xf32>
    %383 = math.exp %382 : vector<2x32xf32>
    %cst_96 = arith.constant 1.000000e+00 : f32
    %384 = vector.broadcast %cst_96 : f32 to vector<2x32xf32>
    %385 = arith.addf %384, %383 : vector<2x32xf32>
    %386 = arith.divf %384, %385 : vector<2x32xf32>
    %387 = arith.mulf %378, %312 : vector<2x32xf32>
    %388 = arith.mulf %372, %380 : vector<2x32xf32>
    %389 = arith.addf %387, %388 : vector<2x32xf32>
    %390 = math.tanh %389 : vector<2x32xf32>
    %391 = arith.mulf %386, %390 : vector<2x32xf32>
    %392 = arith.index_cast %c4_i32 : i32 to index
    %c0_97 = arith.constant 0 : index
    %c0_98 = arith.constant 0 : index
    %393 = vector.load %arg8[%392, %c0_97, %c0_98] : memref<8x2x32xf32, #tpu.memory_space<vmem>>, vector<1x2x32xf32>
    %394 = vector.shape_cast %393 : vector<1x2x32xf32> to vector<2x32xf32>
    %395 = vector.shape_cast %357 : vector<2x32xf32> to vector<1x2x32xf32>
    tpu.vector_store %arg8[%392, %c0_97, %c0_98], %395 {strides = array<i32>} : memref<8x2x32xf32, #tpu.memory_space<vmem>>, vector<1x2x32xf32>,
    %396 = arith.index_cast %323 : i32 to index
    %c0_99 = arith.constant 0 : index
    %c0_100 = arith.constant 0 : index
    %397 = vector.load %arg9[%396, %c0_99, %c0_100] : memref<8x2x32xf32, #tpu.memory_space<vmem>>, vector<1x2x32xf32>
    %398 = vector.shape_cast %397 : vector<1x2x32xf32> to vector<2x32xf32>
    %399 = vector.shape_cast %391 : vector<2x32xf32> to vector<1x2x32xf32>
    tpu.vector_store %arg9[%396, %c0_99, %c0_100], %399 {strides = array<i32>} : memref<8x2x32xf32, #tpu.memory_space<vmem>>, vector<1x2x32xf32>,
    %c5_i32 = arith.constant 5 : i32
    %c7_i32_101 = arith.constant 7 : i32
    %400 = arith.subi %c7_i32_101, %c5_i32 : i32
    %401 = arith.index_cast %c5_i32 : i32 to index
    %c0_102 = arith.constant 0 : index
    %c0_103 = arith.constant 0 : index
    %402 = vector.load %arg2[%401, %c0_102, %c0_103] : memref<8x2x128xbf16, #tpu.memory_space<vmem>>, vector<1x2x128xbf16>
    %403 = vector.shape_cast %402 : vector<1x2x128xbf16> to vector<2x128xbf16>
    %404 = arith.extf %403 : vector<2x128xbf16> to vector<2x128xf32>
    %405 = vector.broadcast %5 : vector<1x128xf32> to vector<2x128xf32>
    %406 = arith.addf %404, %405 : vector<2x128xf32>
    %407 = arith.truncf %357 : vector<2x32xf32> to vector<2x32xbf16>
    %cst_104 = arith.constant dense<0.000000e+00> : vector<2x128xf32>
    %408 = tpu.matmul %407, %3, %cst_104 {dimension_numbers = #tpu.dot_dimension_numbers<[1], [0], [0], [1], [0, 0, 1, 1], [], []>} : vector<2x32xbf16>, vector<32x128xbf16>, vector<2x128xf32> -> vector<2x128xf32>
    %409 = arith.addf %406, %408 : vector<2x128xf32>
    %410 = vector.extract_strided_slice %409 {offsets = [0, 0], sizes = [2, 32], strides = [1, 1]} : vector<2x128xf32> to vector<2x32xf32>
    %411 = arith.negf %410 : vector<2x32xf32>
    %412 = math.exp %411 : vector<2x32xf32>
    %cst_105 = arith.constant 1.000000e+00 : f32
    %413 = vector.broadcast %cst_105 : f32 to vector<2x32xf32>
    %414 = arith.addf %413, %412 : vector<2x32xf32>
    %415 = arith.divf %413, %414 : vector<2x32xf32>
    %416 = vector.extract_strided_slice %409 {offsets = [0, 32], sizes = [2, 32], strides = [1, 1]} : vector<2x128xf32> to vector<2x32xf32>
    %417 = arith.negf %416 : vector<2x32xf32>
    %418 = math.exp %417 : vector<2x32xf32>
    %cst_106 = arith.constant 1.000000e+00 : f32
    %419 = vector.broadcast %cst_106 : f32 to vector<2x32xf32>
    %420 = arith.addf %419, %418 : vector<2x32xf32>
    %421 = arith.divf %419, %420 : vector<2x32xf32>
    %422 = vector.extract_strided_slice %409 {offsets = [0, 64], sizes = [2, 32], strides = [1, 1]} : vector<2x128xf32> to vector<2x32xf32>
    %423 = math.tanh %422 : vector<2x32xf32>
    %424 = vector.extract_strided_slice %409 {offsets = [0, 96], sizes = [2, 32], strides = [1, 1]} : vector<2x128xf32> to vector<2x32xf32>
    %425 = arith.negf %424 : vector<2x32xf32>
    %426 = math.exp %425 : vector<2x32xf32>
    %cst_107 = arith.constant 1.000000e+00 : f32
    %427 = vector.broadcast %cst_107 : f32 to vector<2x32xf32>
    %428 = arith.addf %427, %426 : vector<2x32xf32>
    %429 = arith.divf %427, %428 : vector<2x32xf32>
    %430 = arith.mulf %421, %355 : vector<2x32xf32>
    %431 = arith.mulf %415, %423 : vector<2x32xf32>
    %432 = arith.addf %430, %431 : vector<2x32xf32>
    %433 = math.tanh %432 : vector<2x32xf32>
    %434 = arith.mulf %429, %433 : vector<2x32xf32>
    %435 = arith.index_cast %400 : i32 to index
    %c0_108 = arith.constant 0 : index
    %c0_109 = arith.constant 0 : index
    %436 = vector.load %arg3[%435, %c0_108, %c0_109] : memref<8x2x128xbf16, #tpu.memory_space<vmem>>, vector<1x2x128xbf16>
    %437 = vector.shape_cast %436 : vector<1x2x128xbf16> to vector<2x128xbf16>
    %438 = arith.extf %437 : vector<2x128xbf16> to vector<2x128xf32>
    %439 = vector.broadcast %6 : vector<1x128xf32> to vector<2x128xf32>
    %440 = arith.addf %438, %439 : vector<2x128xf32>
    %441 = arith.truncf %391 : vector<2x32xf32> to vector<2x32xbf16>
    %cst_110 = arith.constant dense<0.000000e+00> : vector<2x128xf32>
    %442 = tpu.matmul %441, %4, %cst_110 {dimension_numbers = #tpu.dot_dimension_numbers<[1], [0], [0], [1], [0, 0, 1, 1], [], []>} : vector<2x32xbf16>, vector<32x128xbf16>, vector<2x128xf32> -> vector<2x128xf32>
    %443 = arith.addf %440, %442 : vector<2x128xf32>
    %444 = vector.extract_strided_slice %443 {offsets = [0, 0], sizes = [2, 32], strides = [1, 1]} : vector<2x128xf32> to vector<2x32xf32>
    %445 = arith.negf %444 : vector<2x32xf32>
    %446 = math.exp %445 : vector<2x32xf32>
    %cst_111 = arith.constant 1.000000e+00 : f32
    %447 = vector.broadcast %cst_111 : f32 to vector<2x32xf32>
    %448 = arith.addf %447, %446 : vector<2x32xf32>
    %449 = arith.divf %447, %448 : vector<2x32xf32>
    %450 = vector.extract_strided_slice %443 {offsets = [0, 32], sizes = [2, 32], strides = [1, 1]} : vector<2x128xf32> to vector<2x32xf32>
    %451 = arith.negf %450 : vector<2x32xf32>
    %452 = math.exp %451 : vector<2x32xf32>
    %cst_112 = arith.constant 1.000000e+00 : f32
    %453 = vector.broadcast %cst_112 : f32 to vector<2x32xf32>
    %454 = arith.addf %453, %452 : vector<2x32xf32>
    %455 = arith.divf %453, %454 : vector<2x32xf32>
    %456 = vector.extract_strided_slice %443 {offsets = [0, 64], sizes = [2, 32], strides = [1, 1]} : vector<2x128xf32> to vector<2x32xf32>
    %457 = math.tanh %456 : vector<2x32xf32>
    %458 = vector.extract_strided_slice %443 {offsets = [0, 96], sizes = [2, 32], strides = [1, 1]} : vector<2x128xf32> to vector<2x32xf32>
    %459 = arith.negf %458 : vector<2x32xf32>
    %460 = math.exp %459 : vector<2x32xf32>
    %cst_113 = arith.constant 1.000000e+00 : f32
    %461 = vector.broadcast %cst_113 : f32 to vector<2x32xf32>
    %462 = arith.addf %461, %460 : vector<2x32xf32>
    %463 = arith.divf %461, %462 : vector<2x32xf32>
    %464 = arith.mulf %455, %389 : vector<2x32xf32>
    %465 = arith.mulf %449, %457 : vector<2x32xf32>
    %466 = arith.addf %464, %465 : vector<2x32xf32>
    %467 = math.tanh %466 : vector<2x32xf32>
    %468 = arith.mulf %463, %467 : vector<2x32xf32>
    %469 = arith.index_cast %c5_i32 : i32 to index
    %c0_114 = arith.constant 0 : index
    %c0_115 = arith.constant 0 : index
    %470 = vector.load %arg8[%469, %c0_114, %c0_115] : memref<8x2x32xf32, #tpu.memory_space<vmem>>, vector<1x2x32xf32>
    %471 = vector.shape_cast %470 : vector<1x2x32xf32> to vector<2x32xf32>
    %472 = vector.shape_cast %434 : vector<2x32xf32> to vector<1x2x32xf32>
    tpu.vector_store %arg8[%469, %c0_114, %c0_115], %472 {strides = array<i32>} : memref<8x2x32xf32, #tpu.memory_space<vmem>>, vector<1x2x32xf32>,
    %473 = arith.index_cast %400 : i32 to index
    %c0_116 = arith.constant 0 : index
    %c0_117 = arith.constant 0 : index
    %474 = vector.load %arg9[%473, %c0_116, %c0_117] : memref<8x2x32xf32, #tpu.memory_space<vmem>>, vector<1x2x32xf32>
    %475 = vector.shape_cast %474 : vector<1x2x32xf32> to vector<2x32xf32>
    %476 = vector.shape_cast %468 : vector<2x32xf32> to vector<1x2x32xf32>
    tpu.vector_store %arg9[%473, %c0_116, %c0_117], %476 {strides = array<i32>} : memref<8x2x32xf32, #tpu.memory_space<vmem>>, vector<1x2x32xf32>,
    %c6_i32 = arith.constant 6 : i32
    %c7_i32_118 = arith.constant 7 : i32
    %477 = arith.subi %c7_i32_118, %c6_i32 : i32
    %478 = arith.index_cast %c6_i32 : i32 to index
    %c0_119 = arith.constant 0 : index
    %c0_120 = arith.constant 0 : index
    %479 = vector.load %arg2[%478, %c0_119, %c0_120] : memref<8x2x128xbf16, #tpu.memory_space<vmem>>, vector<1x2x128xbf16>
    %480 = vector.shape_cast %479 : vector<1x2x128xbf16> to vector<2x128xbf16>
    %481 = arith.extf %480 : vector<2x128xbf16> to vector<2x128xf32>
    %482 = vector.broadcast %5 : vector<1x128xf32> to vector<2x128xf32>
    %483 = arith.addf %481, %482 : vector<2x128xf32>
    %484 = arith.truncf %434 : vector<2x32xf32> to vector<2x32xbf16>
    %cst_121 = arith.constant dense<0.000000e+00> : vector<2x128xf32>
    %485 = tpu.matmul %484, %3, %cst_121 {dimension_numbers = #tpu.dot_dimension_numbers<[1], [0], [0], [1], [0, 0, 1, 1], [], []>} : vector<2x32xbf16>, vector<32x128xbf16>, vector<2x128xf32> -> vector<2x128xf32>
    %486 = arith.addf %483, %485 : vector<2x128xf32>
    %487 = vector.extract_strided_slice %486 {offsets = [0, 0], sizes = [2, 32], strides = [1, 1]} : vector<2x128xf32> to vector<2x32xf32>
    %488 = arith.negf %487 : vector<2x32xf32>
    %489 = math.exp %488 : vector<2x32xf32>
    %cst_122 = arith.constant 1.000000e+00 : f32
    %490 = vector.broadcast %cst_122 : f32 to vector<2x32xf32>
    %491 = arith.addf %490, %489 : vector<2x32xf32>
    %492 = arith.divf %490, %491 : vector<2x32xf32>
    %493 = vector.extract_strided_slice %486 {offsets = [0, 32], sizes = [2, 32], strides = [1, 1]} : vector<2x128xf32> to vector<2x32xf32>
    %494 = arith.negf %493 : vector<2x32xf32>
    %495 = math.exp %494 : vector<2x32xf32>
    %cst_123 = arith.constant 1.000000e+00 : f32
    %496 = vector.broadcast %cst_123 : f32 to vector<2x32xf32>
    %497 = arith.addf %496, %495 : vector<2x32xf32>
    %498 = arith.divf %496, %497 : vector<2x32xf32>
    %499 = vector.extract_strided_slice %486 {offsets = [0, 64], sizes = [2, 32], strides = [1, 1]} : vector<2x128xf32> to vector<2x32xf32>
    %500 = math.tanh %499 : vector<2x32xf32>
    %501 = vector.extract_strided_slice %486 {offsets = [0, 96], sizes = [2, 32], strides = [1, 1]} : vector<2x128xf32> to vector<2x32xf32>
    %502 = arith.negf %501 : vector<2x32xf32>
    %503 = math.exp %502 : vector<2x32xf32>
    %cst_124 = arith.constant 1.000000e+00 : f32
    %504 = vector.broadcast %cst_124 : f32 to vector<2x32xf32>
    %505 = arith.addf %504, %503 : vector<2x32xf32>
    %506 = arith.divf %504, %505 : vector<2x32xf32>
    %507 = arith.mulf %498, %432 : vector<2x32xf32>
    %508 = arith.mulf %492, %500 : vector<2x32xf32>
    %509 = arith.addf %507, %508 : vector<2x32xf32>
    %510 = math.tanh %509 : vector<2x32xf32>
    %511 = arith.mulf %506, %510 : vector<2x32xf32>
    %512 = arith.index_cast %477 : i32 to index
    %c0_125 = arith.constant 0 : index
    %c0_126 = arith.constant 0 : index
    %513 = vector.load %arg3[%512, %c0_125, %c0_126] : memref<8x2x128xbf16, #tpu.memory_space<vmem>>, vector<1x2x128xbf16>
    %514 = vector.shape_cast %513 : vector<1x2x128xbf16> to vector<2x128xbf16>
    %515 = arith.extf %514 : vector<2x128xbf16> to vector<2x128xf32>
    %516 = vector.broadcast %6 : vector<1x128xf32> to vector<2x128xf32>
    %517 = arith.addf %515, %516 : vector<2x128xf32>
    %518 = arith.truncf %468 : vector<2x32xf32> to vector<2x32xbf16>
    %cst_127 = arith.constant dense<0.000000e+00> : vector<2x128xf32>
    %519 = tpu.matmul %518, %4, %cst_127 {dimension_numbers = #tpu.dot_dimension_numbers<[1], [0], [0], [1], [0, 0, 1, 1], [], []>} : vector<2x32xbf16>, vector<32x128xbf16>, vector<2x128xf32> -> vector<2x128xf32>
    %520 = arith.addf %517, %519 : vector<2x128xf32>
    %521 = vector.extract_strided_slice %520 {offsets = [0, 0], sizes = [2, 32], strides = [1, 1]} : vector<2x128xf32> to vector<2x32xf32>
    %522 = arith.negf %521 : vector<2x32xf32>
    %523 = math.exp %522 : vector<2x32xf32>
    %cst_128 = arith.constant 1.000000e+00 : f32
    %524 = vector.broadcast %cst_128 : f32 to vector<2x32xf32>
    %525 = arith.addf %524, %523 : vector<2x32xf32>
    %526 = arith.divf %524, %525 : vector<2x32xf32>
    %527 = vector.extract_strided_slice %520 {offsets = [0, 32], sizes = [2, 32], strides = [1, 1]} : vector<2x128xf32> to vector<2x32xf32>
    %528 = arith.negf %527 : vector<2x32xf32>
    %529 = math.exp %528 : vector<2x32xf32>
    %cst_129 = arith.constant 1.000000e+00 : f32
    %530 = vector.broadcast %cst_129 : f32 to vector<2x32xf32>
    %531 = arith.addf %530, %529 : vector<2x32xf32>
    %532 = arith.divf %530, %531 : vector<2x32xf32>
    %533 = vector.extract_strided_slice %520 {offsets = [0, 64], sizes = [2, 32], strides = [1, 1]} : vector<2x128xf32> to vector<2x32xf32>
    %534 = math.tanh %533 : vector<2x32xf32>
    %535 = vector.extract_strided_slice %520 {offsets = [0, 96], sizes = [2, 32], strides = [1, 1]} : vector<2x128xf32> to vector<2x32xf32>
    %536 = arith.negf %535 : vector<2x32xf32>
    %537 = math.exp %536 : vector<2x32xf32>
    %cst_130 = arith.constant 1.000000e+00 : f32
    %538 = vector.broadcast %cst_130 : f32 to vector<2x32xf32>
    %539 = arith.addf %538, %537 : vector<2x32xf32>
    %540 = arith.divf %538, %539 : vector<2x32xf32>
    %541 = arith.mulf %532, %466 : vector<2x32xf32>
    %542 = arith.mulf %526, %534 : vector<2x32xf32>
    %543 = arith.addf %541, %542 : vector<2x32xf32>
    %544 = math.tanh %543 : vector<2x32xf32>
    %545 = arith.mulf %540, %544 : vector<2x32xf32>
    %546 = arith.index_cast %c6_i32 : i32 to index
    %c0_131 = arith.constant 0 : index
    %c0_132 = arith.constant 0 : index
    %547 = vector.load %arg8[%546, %c0_131, %c0_132] : memref<8x2x32xf32, #tpu.memory_space<vmem>>, vector<1x2x32xf32>
    %548 = vector.shape_cast %547 : vector<1x2x32xf32> to vector<2x32xf32>
    %549 = vector.shape_cast %511 : vector<2x32xf32> to vector<1x2x32xf32>
    tpu.vector_store %arg8[%546, %c0_131, %c0_132], %549 {strides = array<i32>} : memref<8x2x32xf32, #tpu.memory_space<vmem>>, vector<1x2x32xf32>,
    %550 = arith.index_cast %477 : i32 to index
    %c0_133 = arith.constant 0 : index
    %c0_134 = arith.constant 0 : index
    %551 = vector.load %arg9[%550, %c0_133, %c0_134] : memref<8x2x32xf32, #tpu.memory_space<vmem>>, vector<1x2x32xf32>
    %552 = vector.shape_cast %551 : vector<1x2x32xf32> to vector<2x32xf32>
    %553 = vector.shape_cast %545 : vector<2x32xf32> to vector<1x2x32xf32>
    tpu.vector_store %arg9[%550, %c0_133, %c0_134], %553 {strides = array<i32>} : memref<8x2x32xf32, #tpu.memory_space<vmem>>, vector<1x2x32xf32>,
    %c7_i32_135 = arith.constant 7 : i32
    %c7_i32_136 = arith.constant 7 : i32
    %554 = arith.subi %c7_i32_136, %c7_i32_135 : i32
    %555 = arith.index_cast %c7_i32_135 : i32 to index
    %c0_137 = arith.constant 0 : index
    %c0_138 = arith.constant 0 : index
    %556 = vector.load %arg2[%555, %c0_137, %c0_138] : memref<8x2x128xbf16, #tpu.memory_space<vmem>>, vector<1x2x128xbf16>
    %557 = vector.shape_cast %556 : vector<1x2x128xbf16> to vector<2x128xbf16>
    %558 = arith.extf %557 : vector<2x128xbf16> to vector<2x128xf32>
    %559 = vector.broadcast %5 : vector<1x128xf32> to vector<2x128xf32>
    %560 = arith.addf %558, %559 : vector<2x128xf32>
    %561 = arith.truncf %511 : vector<2x32xf32> to vector<2x32xbf16>
    %cst_139 = arith.constant dense<0.000000e+00> : vector<2x128xf32>
    %562 = tpu.matmul %561, %3, %cst_139 {dimension_numbers = #tpu.dot_dimension_numbers<[1], [0], [0], [1], [0, 0, 1, 1], [], []>} : vector<2x32xbf16>, vector<32x128xbf16>, vector<2x128xf32> -> vector<2x128xf32>
    %563 = arith.addf %560, %562 : vector<2x128xf32>
    %564 = vector.extract_strided_slice %563 {offsets = [0, 0], sizes = [2, 32], strides = [1, 1]} : vector<2x128xf32> to vector<2x32xf32>
    %565 = arith.negf %564 : vector<2x32xf32>
    %566 = math.exp %565 : vector<2x32xf32>
    %cst_140 = arith.constant 1.000000e+00 : f32
    %567 = vector.broadcast %cst_140 : f32 to vector<2x32xf32>
    %568 = arith.addf %567, %566 : vector<2x32xf32>
    %569 = arith.divf %567, %568 : vector<2x32xf32>
    %570 = vector.extract_strided_slice %563 {offsets = [0, 32], sizes = [2, 32], strides = [1, 1]} : vector<2x128xf32> to vector<2x32xf32>
    %571 = arith.negf %570 : vector<2x32xf32>
    %572 = math.exp %571 : vector<2x32xf32>
    %cst_141 = arith.constant 1.000000e+00 : f32
    %573 = vector.broadcast %cst_141 : f32 to vector<2x32xf32>
    %574 = arith.addf %573, %572 : vector<2x32xf32>
    %575 = arith.divf %573, %574 : vector<2x32xf32>
    %576 = vector.extract_strided_slice %563 {offsets = [0, 64], sizes = [2, 32], strides = [1, 1]} : vector<2x128xf32> to vector<2x32xf32>
    %577 = math.tanh %576 : vector<2x32xf32>
    %578 = vector.extract_strided_slice %563 {offsets = [0, 96], sizes = [2, 32], strides = [1, 1]} : vector<2x128xf32> to vector<2x32xf32>
    %579 = arith.negf %578 : vector<2x32xf32>
    %580 = math.exp %579 : vector<2x32xf32>
    %cst_142 = arith.constant 1.000000e+00 : f32
    %581 = vector.broadcast %cst_142 : f32 to vector<2x32xf32>
    %582 = arith.addf %581, %580 : vector<2x32xf32>
    %583 = arith.divf %581, %582 : vector<2x32xf32>
    %584 = arith.mulf %575, %509 : vector<2x32xf32>
    %585 = arith.mulf %569, %577 : vector<2x32xf32>
    %586 = arith.addf %584, %585 : vector<2x32xf32>
    %587 = math.tanh %586 : vector<2x32xf32>
    %588 = arith.mulf %583, %587 : vector<2x32xf32>
    %589 = arith.index_cast %554 : i32 to index
    %c0_143 = arith.constant 0 : index
    %c0_144 = arith.constant 0 : index
    %590 = vector.load %arg3[%589, %c0_143, %c0_144] : memref<8x2x128xbf16, #tpu.memory_space<vmem>>, vector<1x2x128xbf16>
    %591 = vector.shape_cast %590 : vector<1x2x128xbf16> to vector<2x128xbf16>
    %592 = arith.extf %591 : vector<2x128xbf16> to vector<2x128xf32>
    %593 = vector.broadcast %6 : vector<1x128xf32> to vector<2x128xf32>
    %594 = arith.addf %592, %593 : vector<2x128xf32>
    %595 = arith.truncf %545 : vector<2x32xf32> to vector<2x32xbf16>
    %cst_145 = arith.constant dense<0.000000e+00> : vector<2x128xf32>
    %596 = tpu.matmul %595, %4, %cst_145 {dimension_numbers = #tpu.dot_dimension_numbers<[1], [0], [0], [1], [0, 0, 1, 1], [], []>} : vector<2x32xbf16>, vector<32x128xbf16>, vector<2x128xf32> -> vector<2x128xf32>
    %597 = arith.addf %594, %596 : vector<2x128xf32>
    %598 = vector.extract_strided_slice %597 {offsets = [0, 0], sizes = [2, 32], strides = [1, 1]} : vector<2x128xf32> to vector<2x32xf32>
    %599 = arith.negf %598 : vector<2x32xf32>
    %600 = math.exp %599 : vector<2x32xf32>
    %cst_146 = arith.constant 1.000000e+00 : f32
    %601 = vector.broadcast %cst_146 : f32 to vector<2x32xf32>
    %602 = arith.addf %601, %600 : vector<2x32xf32>
    %603 = arith.divf %601, %602 : vector<2x32xf32>
    %604 = vector.extract_strided_slice %597 {offsets = [0, 32], sizes = [2, 32], strides = [1, 1]} : vector<2x128xf32> to vector<2x32xf32>
    %605 = arith.negf %604 : vector<2x32xf32>
    %606 = math.exp %605 : vector<2x32xf32>
    %cst_147 = arith.constant 1.000000e+00 : f32
    %607 = vector.broadcast %cst_147 : f32 to vector<2x32xf32>
    %608 = arith.addf %607, %606 : vector<2x32xf32>
    %609 = arith.divf %607, %608 : vector<2x32xf32>
    %610 = vector.extract_strided_slice %597 {offsets = [0, 64], sizes = [2, 32], strides = [1, 1]} : vector<2x128xf32> to vector<2x32xf32>
    %611 = math.tanh %610 : vector<2x32xf32>
    %612 = vector.extract_strided_slice %597 {offsets = [0, 96], sizes = [2, 32], strides = [1, 1]} : vector<2x128xf32> to vector<2x32xf32>
    %613 = arith.negf %612 : vector<2x32xf32>
    %614 = math.exp %613 : vector<2x32xf32>
    %cst_148 = arith.constant 1.000000e+00 : f32
    %615 = vector.broadcast %cst_148 : f32 to vector<2x32xf32>
    %616 = arith.addf %615, %614 : vector<2x32xf32>
    %617 = arith.divf %615, %616 : vector<2x32xf32>
    %618 = arith.mulf %609, %543 : vector<2x32xf32>
    %619 = arith.mulf %603, %611 : vector<2x32xf32>
    %620 = arith.addf %618, %619 : vector<2x32xf32>
    %621 = math.tanh %620 : vector<2x32xf32>
    %622 = arith.mulf %617, %621 : vector<2x32xf32>
    %623 = arith.index_cast %c7_i32_135 : i32 to index
    %c0_149 = arith.constant 0 : index
    %c0_150 = arith.constant 0 : index
    %624 = vector.load %arg8[%623, %c0_149, %c0_150] : memref<8x2x32xf32, #tpu.memory_space<vmem>>, vector<1x2x32xf32>
    %625 = vector.shape_cast %624 : vector<1x2x32xf32> to vector<2x32xf32>
    %626 = vector.shape_cast %588 : vector<2x32xf32> to vector<1x2x32xf32>
    tpu.vector_store %arg8[%623, %c0_149, %c0_150], %626 {strides = array<i32>} : memref<8x2x32xf32, #tpu.memory_space<vmem>>, vector<1x2x32xf32>,
    %627 = arith.index_cast %554 : i32 to index
    %c0_151 = arith.constant 0 : index
    %c0_152 = arith.constant 0 : index
    %628 = vector.load %arg9[%627, %c0_151, %c0_152] : memref<8x2x32xf32, #tpu.memory_space<vmem>>, vector<1x2x32xf32>
    %629 = vector.shape_cast %628 : vector<1x2x32xf32> to vector<2x32xf32>
    %630 = vector.shape_cast %622 : vector<2x32xf32> to vector<1x2x32xf32>
    tpu.vector_store %arg9[%627, %c0_151, %c0_152], %630 {strides = array<i32>} : memref<8x2x32xf32, #tpu.memory_space<vmem>>, vector<1x2x32xf32>,
    %c8_i32 = arith.constant 8 : i32
    %c0_153 = arith.constant 0 : index
    %c0_154 = arith.constant 0 : index
    %c0_155 = arith.constant 0 : index
    %631 = vector.load %arg10[%c0_153, %c0_154, %c0_155] : memref<4x2x32xf32, #tpu.memory_space<vmem>>, vector<1x2x32xf32>
    %632 = vector.shape_cast %631 : vector<1x2x32xf32> to vector<2x32xf32>
    %633 = vector.shape_cast %588 : vector<2x32xf32> to vector<1x2x32xf32>
    tpu.vector_store %arg10[%c0_153, %c0_154, %c0_155], %633 {strides = array<i32>} : memref<4x2x32xf32, #tpu.memory_space<vmem>>, vector<1x2x32xf32>,
    %c1_156 = arith.constant 1 : index
    %c0_157 = arith.constant 0 : index
    %c0_158 = arith.constant 0 : index
    %634 = vector.load %arg10[%c1_156, %c0_157, %c0_158] : memref<4x2x32xf32, #tpu.memory_space<vmem>>, vector<1x2x32xf32>
    %635 = vector.shape_cast %634 : vector<1x2x32xf32> to vector<2x32xf32>
    %636 = vector.shape_cast %586 : vector<2x32xf32> to vector<1x2x32xf32>
    tpu.vector_store %arg10[%c1_156, %c0_157, %c0_158], %636 {strides = array<i32>} : memref<4x2x32xf32, #tpu.memory_space<vmem>>, vector<1x2x32xf32>,
    %c2_159 = arith.constant 2 : index
    %c0_160 = arith.constant 0 : index
    %c0_161 = arith.constant 0 : index
    %637 = vector.load %arg10[%c2_159, %c0_160, %c0_161] : memref<4x2x32xf32, #tpu.memory_space<vmem>>, vector<1x2x32xf32>
    %638 = vector.shape_cast %637 : vector<1x2x32xf32> to vector<2x32xf32>
    %639 = vector.shape_cast %622 : vector<2x32xf32> to vector<1x2x32xf32>
    tpu.vector_store %arg10[%c2_159, %c0_160, %c0_161], %639 {strides = array<i32>} : memref<4x2x32xf32, #tpu.memory_space<vmem>>, vector<1x2x32xf32>,
    %c3_162 = arith.constant 3 : index
    %c0_163 = arith.constant 0 : index
    %c0_164 = arith.constant 0 : index
    %640 = vector.load %arg10[%c3_162, %c0_163, %c0_164] : memref<4x2x32xf32, #tpu.memory_space<vmem>>, vector<1x2x32xf32>
    %641 = vector.shape_cast %640 : vector<1x2x32xf32> to vector<2x32xf32>
    %642 = vector.shape_cast %620 : vector<2x32xf32> to vector<1x2x32xf32>
    tpu.vector_store %arg10[%c3_162, %c0_163, %c0_164], %642 {strides = array<i32>} : memref<4x2x32xf32, #tpu.memory_space<vmem>>, vector<1x2x32xf32>,
    return
  }
  func.func @transform_0(%arg0: i32, %arg1: i32) -> (i32, i32, i32) {
    %c0_i32 = arith.constant 0 : i32
    %c0_i32_0 = arith.constant 0 : i32
    return %arg1, %arg0, %c0_i32 : i32, i32, i32
  }
  func.func @transform_1(%arg0: i32, %arg1: i32) -> (i32, i32, i32) {
    %c0_i32 = arith.constant 0 : i32
    %0 = arith.subi %c0_i32, %arg1 : i32
    %c0_i32_0 = arith.constant 0 : i32
    %c0_i32_1 = arith.constant 0 : i32
    return %0, %arg0, %c0_i32_0 : i32, i32, i32
  }
  func.func @transform_2(%arg0: i32, %arg1: i32) -> (i32, i32) {
    %c0_i32 = arith.constant 0 : i32
    %c0_i32_0 = arith.constant 0 : i32
    %c0_i32_1 = arith.constant 0 : i32
    return %c0_i32, %c0_i32_0 : i32, i32
  }
  func.func @transform_3(%arg0: i32, %arg1: i32) -> (i32, i32) {
    %c0_i32 = arith.constant 0 : i32
    %c0_i32_0 = arith.constant 0 : i32
    %c0_i32_1 = arith.constant 0 : i32
    return %c0_i32, %c0_i32_0 : i32, i32
  }
  func.func @transform_4(%arg0: i32, %arg1: i32) -> (i32, i32) {
    %c0_i32 = arith.constant 0 : i32
    %c0_i32_0 = arith.constant 0 : i32
    %c0_i32_1 = arith.constant 0 : i32
    return %c0_i32, %c0_i32_0 : i32, i32
  }
  func.func @transform_5(%arg0: i32, %arg1: i32) -> (i32, i32) {
    %c0_i32 = arith.constant 0 : i32
    %c0_i32_0 = arith.constant 0 : i32
    %c0_i32_1 = arith.constant 0 : i32
    return %c0_i32, %c0_i32_0 : i32, i32
  }
  func.func @transform_6(%arg0: i32, %arg1: i32) -> (i32, i32, i32) {
    %c0_i32 = arith.constant 0 : i32
    %c0_i32_0 = arith.constant 0 : i32
    return %arg1, %arg0, %c0_i32 : i32, i32, i32
  }
  func.func @transform_7(%arg0: i32, %arg1: i32) -> (i32, i32, i32) {
    %c0_i32 = arith.constant 0 : i32
    %0 = arith.subi %c0_i32, %arg1 : i32
    %c0_i32_0 = arith.constant 0 : i32
    %c0_i32_1 = arith.constant 0 : i32
    return %0, %arg0, %c0_i32_0 : i32, i32, i32
  }
}

</mosaic_0001>

<bundles_post_ra>
// kernel: lstm_net_forward.5
= control target key start
LH: loop header
LB: loop body
LE: loop exit
PB: predicated region body
PF: predicated region fallthrough
CT: control target
= control target key end

     0   :  { %s1271_s0 = inlined_call_operand.vmem [shape: f32[2,32], index: 0, kind: input, shape index: {}]   ;;  %s1272_s1 = inlined_call_operand.vmem [shape: f32[2,32], index: 1, kind: input, shape index: {}]   ;;  %s1273_s2 = inlined_call_operand.vmem [shape: f32[32,1024], index: 2, kind: input, shape index: {}]   ;;  %s1274_s3 = inlined_call_operand.vmem [shape: f32[32,1024], index: 3, kind: input, shape index: {}]   ;;  %s1275_s4 = inlined_call_operand.hbm [shape: f32[1,1024], index: 4, kind: input, shape index: {}]   ;;  %s1276_s5 = inlined_call_operand.hbm [shape: f32[1,1024], index: 5, kind: input, shape index: {}]   ;;  %s1277_s6 = inlined_call_operand.<no memory space> [shape: f32[1,1], index: 6, kind: input, shape index: {}]   ;;  %s1278_s7 = inlined_call_operand.vmem [shape: f32[2,1], index: 7, kind: output, shape index: {}]  }
   0x1   :  { %v12_v0 = vstv %s1277_s6 }
   0x2   :  { %13 = vst [vmem:[#allocation2] sm:$0x1] %v12_v0 }
   0x3   :  { %14 = vsyncpa [#allocation4], 0 }
   0x4   :  { %15 = vsyncpa [#allocation6], 0  ;;  %s970_s26 = smov [#allocation3]   ;;  %s971_s28 = smov [#allocation5]  }
   0x5   :  { %s30_s27 = sshll.u32 %s970_s26, 4  ;;  %s40_s29 = sshll.u32 %s971_s28, 4  ;;  %s31_s27 = int_to_ptr.vmem [resolvable:$true] %s30_s27  ;;  %s41_s29 = int_to_ptr.vmem [resolvable:$true] %s40_s29 }
   0x6   :  { %s922_s9 = scalar_lea.hbm %s1275_s4, 128 }
   0x7   :  { %p923_p0 = scmp.ne.s32.totalorder %s1275_s4, %s922_s9  ;;  %p926_p1 = scmp.lt.u32.totalorder %s922_s9, %s1275_s4 }
   0x9   :  { %p928_p2 = pnand %p926_p1, %p923_p0 }
   0xb   :  { %931 = shalt.err (!%p928_p2)
}
   0xc   :  { %s932_s6 = scalar_lea.vmem %s31_s27, 128  ;;  %p937_p4 = scmp.lt.s32.totalorder %s31_s27, %s31_s27 }
   0xd   :  { %p933_p3 = scmp.ne.s32.totalorder %s31_s27, %s932_s6  ;;  %p938_p5 = scmp.lt.s32.totalorder %s932_s6, %s932_s6 }
   0xf   :  { %p939_p6 = por %p938_p5, %p937_p4 }
  0x11   :  { %p940_p7 = pnand %p939_p6, %p933_p3 }
  0x13   :  { %943 = shalt.err (!%p940_p7)
}
  0x14   :  { %33 = dma.hbm_to_vmem [thread:$0]  %s1275_s4, 128, %s31_s27, [#allocation4]  }
  0x15   :  { %s944_s18 = scalar_lea.hbm %s1276_s5, 128 }
  0x16   :  { %p945_p8 = scmp.ne.s32.totalorder %s1276_s5, %s944_s18  ;;  %p948_p9 = scmp.lt.u32.totalorder %s944_s18, %s1276_s5 }
  0x18   :  { %p950_p10 = pnand %p948_p9, %p945_p8 }
  0x1a   :  { %953 = shalt.err (!%p950_p10)
}
  0x1b   :  { %s954_s23 = scalar_lea.vmem %s41_s29, 128  ;;  %p959_p12 = scmp.lt.s32.totalorder %s41_s29, %s41_s29 }
  0x1c   :  { %p955_p11 = scmp.ne.s32.totalorder %s41_s29, %s954_s23  ;;  %p960_p13 = scmp.lt.s32.totalorder %s954_s23, %s954_s23 }
  0x1e   :  { %p961_p0 = por %p960_p13, %p959_p12 }
  0x20   :  { %p962_p1 = pnand %p961_p0, %p955_p11 }
  0x22   :  { %965 = shalt.err (!%p962_p1)
}
  0x23   :  { %43 = dma.hbm_to_vmem [thread:$0]  %s1276_s5, 128, %s41_s29, [#allocation6]  }
  0x24   :  { %966 = dma.done.wait [#allocation4], 128  }
  0x25   :  { %967 = vsyncadd [#allocation4], 4294967168 }
  0x26   :  { %968 = dma.done.wait [#allocation6], 128  }
  0x27   :  { %969 = vsyncadd [#allocation6], 4294967168  ;;  %v972_v1 = vmov 0.0   ;;  %v87_v2 = vld [vmem:[%s1274_s3 + $0x8] sm:$0xff]  ;;  %v89_v4 = vld [vmem:[%s1274_s3 + $0x18] sm:$0xff]  ;;  %vm118_vm0 = vcmask 261120  }
  0x28   :  { %186 = vmatprep.mubr.f32.mxu0 %v972_v1  ;;  %257 = vmatprep.mubr.f32.mxu1 %v972_v1  ;;  %v95_v3 = vld [vmem:[%s1274_s3 + $0x48] sm:$0xff]  ;;  %v97_v6 = vld [vmem:[%s1274_s3 + $0x58] sm:$0xff]  ;;  %v86_v7 = vld [vmem:[%s1274_s3] sm:$0xff]  ;;  %vm793_vm1 = vcmask 1041408   ;;  %vm825_vm2 = vcmask 1024  }
  0x29   :  { %v843_v5 = vpack.c.bf16 %v95_v3, %v87_v2  ;;  %v94_v8 = vld [vmem:[%s1274_s3 + $0x40] sm:$0xff]  ;;  %v851_v9 = vpack.c.bf16 %v97_v6, %v89_v4  ;;  %v88_v11 = vld [vmem:[%s1274_s3 + $0x10] sm:$0xff]  ;;  %v103_v13 = vld [vmem:[%s1274_s3 + $0x88] sm:$0xff] }
  0x2a   :  { %v845_v10 = vpack.c.bf16 %v94_v8, %v86_v7  ;;  %v96_v12 = vld [vmem:[%s1274_s3 + $0x50] sm:$0xff]  ;;  %v111_v15 = vld [vmem:[%s1274_s3 + $0xc8] sm:$0xff]  ;;  %v105_v16 = vld [vmem:[%s1274_s3 + $0x98] sm:$0xff] }
  0x2b   :  { %844 = vmatprep.subr.bf16.mxu0 %v843_v5  ;;  %v853_v14 = vpack.c.bf16 %v96_v12, %v88_v11  ;;  %v113_v17 = vld [vmem:[%s1274_s3 + $0xd8] sm:$0xff]  ;;  %852 = vmatprep.subr.bf16.mxu1 %v851_v9  ;;  %v847_v18 = vpack.c.bf16 %v111_v15, %v103_v13  ;;  %v102_v20 = vld [vmem:[%s1274_s3 + $0x80] sm:$0xff]  ;;  %v104_v22 = vld [vmem:[%s1274_s3 + $0x90] sm:$0xff] }
  0x2c   :  { %846 = vmatpush1.bf16.msra.mxu0 %v845_v10  ;;  %v855_v19 = vpack.c.bf16 %v113_v17, %v105_v16  ;;  %v110_v21 = vld [vmem:[%s1274_s3 + $0xc0] sm:$0xff]  ;;  %v112_v24 = vld [vmem:[%s1274_s3 + $0xd0] sm:$0xff]  ;;  %v91_v25 = vld [vmem:[%s1274_s3 + $0x28] sm:$0xff] }
  0x2d   :  { %854 = vmatpush1.bf16.msra.mxu1 %v853_v14  ;;  %v849_v23 = vpack.c.bf16 %v110_v21, %v102_v20  ;;  %v99_v26 = vld [vmem:[%s1274_s3 + $0x68] sm:$0xff]  ;;  %848 = vmatprep.subr.bf16.mxu0 %v847_v18  ;;  %v857_v27 = vpack.c.bf16 %v112_v24, %v104_v22  ;;  %v93_v29 = vld [vmem:[%s1274_s3 + $0x38] sm:$0xff]  ;;  %v1105_v31 = vld [vmem:[%s1272_s1] sm:$0x3] }
  0x2e   :  { %856 = vmatprep.subr.bf16.mxu1 %v855_v19  ;;  %v859_v28 = vpack.c.bf16 %v99_v26, %v91_v25  ;;  %v101_v30 = vld [vmem:[%s1274_s3 + $0x78] sm:$0xff]  ;;  %v90_v33 = vld [vmem:[%s1274_s3 + $0x20] sm:$0xff]  ;;  %v92_v35 = vld [vmem:[%s1274_s3 + $0x30] sm:$0xff] }
  0x2f   :  { %v867_v32 = vpack.c.bf16 %v101_v30, %v93_v29  ;;  %v98_v34 = vld [vmem:[%s1274_s3 + $0x60] sm:$0xff]  ;;  %v100_v37 = vld [vmem:[%s1274_s3 + $0x70] sm:$0xff]  ;;  %v107_v38 = vld [vmem:[%s1274_s3 + $0xa8] sm:$0xff] }
  0x30   :  { %850 = vmatpush1.bf16.msra.mxu0 %v849_v23  ;;  %v861_v36 = vpack.c.bf16 %v98_v34, %v90_v33  ;;  %v115_v39 = vld [vmem:[%s1274_s3 + $0xe8] sm:$0xff]  ;;  %v869_v40 = vpack.c.bf16 %v100_v37, %v92_v35  ;;  %v109_v42 = vld [vmem:[%s1274_s3 + $0xb8] sm:$0xff]  ;;  %v106_v44 = vld [vmem:[%s1274_s3 + $0xa0] sm:$0xff]  ;;  %v695_v37 = vlaneseq }
  0x31   :  { %858 = vmatpush1.bf16.msra.mxu1 %v857_v27  ;;  %860 = vmatprep.subr.bf16.mxu0 %v859_v28  ;;  %v863_v41 = vpack.c.bf16 %v115_v39, %v107_v38  ;;  %v117_v43 = vld [vmem:[%s1274_s3 + $0xf8] sm:$0xff]  ;;  %v114_v46 = vld [vmem:[%s1274_s3 + $0xe0] sm:$0xff]  ;;  %v108_v47 = vld [vmem:[%s1274_s3 + $0xb0] sm:$0xff] }
  0x32   :  { %868 = vmatprep.subr.bf16.mxu1 %v867_v32  ;;  %v871_v45 = vpack.c.bf16 %v117_v43, %v109_v42  ;;  %v116_v48 = vld [vmem:[%s1274_s3 + $0xf0] sm:$0xff]  ;;  %v54_v49 = vld [vmem:[%s1273_s2 + $0x8] sm:$0xff]  ;;  %v56_v51 = vld [vmem:[%s1273_s2 + $0x18] sm:$0xff]  ;;  %v865_v52 = vpack.c.bf16 %v114_v46, %v106_v44  ;;  %v696_v38 = vshrl.u32 %v695_v37, 7 }
  0x33   :  { %833 = vmatmul.mubr.msk.f32.vlgmr.msra.gmra.mrb[0].mxu0 %vm118_vm0, %v1105_v31  ;;  %v62_v50 = vld [vmem:[%s1273_s2 + $0x48] sm:$0xff]  ;;  %v64_v53 = vld [vmem:[%s1273_s2 + $0x58] sm:$0xff]  ;;  %v873_v54 = vpack.c.bf16 %v116_v48, %v108_v47  ;;  %v53_v56 = vld [vmem:[%s1273_s2] sm:$0xff] }
  0x34   :  { %834 = vmatmul.mubr.msk.f32.vlgmr.msra.gmra.mrb[0].mxu1 %vm118_vm0, %v1105_v31  ;;  %862 = vmatpush1.bf16.msra.mxu0 %v861_v36  ;;  %v875_v55 = vpack.c.bf16 %v62_v50, %v54_v49  ;;  %v61_v57 = vld [vmem:[%s1273_s2 + $0x40] sm:$0xff]  ;;  %v55_v58 = vld [vmem:[%s1273_s2 + $0x10] sm:$0xff]  ;;  %v883_v59 = vpack.c.bf16 %v64_v53, %v56_v51  ;;  %v70_v61 = vld [vmem:[%s1273_s2 + $0x88] sm:$0xff]  ;;  %v697_v39 = vsub.s32 0, %v696_v38  ;;  %v701_v42 = vsub.s32 1, %v696_v38 }
  0x35   :  { %870 = vmatpush1.bf16.msra.mxu1 %v869_v40  ;;  %864 = vmatprep.subr.bf16.mxu0 %v863_v41  ;;  %v63_v60 = vld [vmem:[%s1273_s2 + $0x50] sm:$0xff]  ;;  %v78_v62 = vld [vmem:[%s1273_s2 + $0xc8] sm:$0xff]  ;;  %v72_v63 = vld [vmem:[%s1273_s2 + $0x98] sm:$0xff]  ;;  %v877_v2 = vpack.c.bf16 %v61_v57, %v53_v56  ;;  %v705_v41 = vsub.s32 2, %v696_v38  ;;  %v709_v43 = vsub.s32 3, %v696_v38  ;;  %v713_v56 = vsub.s32 4, %v696_v38 }
  0x36   :  { %872 = vmatprep.subr.bf16.mxu1 %v871_v45  ;;  %328 = vmatprep.mubr.f32.mxu0 %v972_v1  ;;  %v80_v0 = vld [vmem:[%s1273_s2 + $0xd8] sm:$0xff]  ;;  %v885_v3 = vpack.c.bf16 %v63_v60, %v55_v58  ;;  %v879_v4 = vpack.c.bf16 %v78_v62, %v70_v61  ;;  %v69_v5 = vld [vmem:[%s1273_s2 + $0x80] sm:$0xff]  ;;  %v71_v7 = vld [vmem:[%s1273_s2 + $0x90] sm:$0xff]  ;;  %v721_v60 = vsub.s32 6, %v696_v38  ;;  %v717_v61 = vsub.s32 5, %v696_v38 }
  0x37   :  { %399 = vmatprep.mubr.f32.mxu1 %v972_v1  ;;  %v77_v6 = vld [vmem:[%s1273_s2 + $0xc0] sm:$0xff]  ;;  %v887_v8 = vpack.c.bf16 %v80_v0, %v72_v63  ;;  %v79_v9 = vld [vmem:[%s1273_s2 + $0xd0] sm:$0xff]  ;;  %v58_v10 = vld [vmem:[%s1273_s2 + $0x28] sm:$0xff]  ;;  %v725_v0 = vsub.s32 7, %v696_v38 }
  0x38   :  { %866 = vmatpush1.bf16.msra.mxu0 %v865_v52  ;;  %v66_v11 = vld [vmem:[%s1273_s2 + $0x68] sm:$0xff]  ;;  %v60_v12 = vld [vmem:[%s1273_s2 + $0x38] sm:$0xff]  ;;  %v881_v14 = vpack.c.bf16 %v77_v6, %v69_v5  ;;  %v889_v15 = vpack.c.bf16 %v79_v9, %v71_v7  ;;  %v57_v17 = vld [vmem:[%s1273_s2 + $0x20] sm:$0xff] }
  0x39   :  { %874 = vmatpush1.bf16.msra.mxu1 %v873_v54  ;;  %876 = vmatprep.subr.bf16.mxu0 %v875_v55  ;;  %v68_v13 = vld [vmem:[%s1273_s2 + $0x78] sm:$0xff]  ;;  %v891_v16 = vpack.c.bf16 %v66_v11, %v58_v10  ;;  %v65_v18 = vld [vmem:[%s1273_s2 + $0x60] sm:$0xff]  ;;  %v59_v19 = vld [vmem:[%s1273_s2 + $0x30] sm:$0xff] }
  0x3a   :  { %884 = vmatprep.subr.bf16.mxu1 %v883_v59  ;;  %v899_v20 = vpack.c.bf16 %v68_v13, %v60_v12  ;;  %v67_v21 = vld [vmem:[%s1273_s2 + $0x70] sm:$0xff]  ;;  %v74_v22 = vld [vmem:[%s1273_s2 + $0xa8] sm:$0xff]  ;;  %v76_v24 = vld [vmem:[%s1273_s2 + $0xb8] sm:$0xff]  ;;  %v893_v27 = vpack.c.bf16 %v65_v18, %v57_v17 }
  0x3b   :  { %835 = vmatmul.mubr.msk.f32.vlgmr.msra.gmra.mrb[2].mxu0 %vm118_vm0, %v1105_v31  ;;  %v82_v23 = vld [vmem:[%s1273_s2 + $0xe8] sm:$0xff]  ;;  %v84_v25 = vld [vmem:[%s1273_s2 + $0xf8] sm:$0xff]  ;;  %v52_v26 = vld [vmem:[%s1271_s0] sm:$0x3]  ;;  %v901_v28 = vpack.c.bf16 %v67_v21, %v59_v19 }
  0x3c   :  { %836 = vmatmul.mubr.msk.f32.vlgmr.msra.gmra.mrb[2].mxu1 %vm118_vm0, %v1105_v31  ;;  %878 = vmatpush1.bf16.msra.mxu0 %v877_v2  ;;  %v895_v29 = vpack.c.bf16 %v82_v23, %v74_v22  ;;  %v73_v30 = vld [vmem:[%s1273_s2 + $0xa0] sm:$0xff]  ;;  %v903_v32 = vpack.c.bf16 %v84_v25, %v76_v24  ;;  %v75_v33 = vld [vmem:[%s1273_s2 + $0xb0] sm:$0xff] }
  0x3d   :  { %886 = vmatpush1.bf16.msra.mxu1 %v885_v3  ;;  %880 = vmatprep.subr.bf16.mxu0 %v879_v4  ;;  %v81_v31 = vld [vmem:[%s1273_s2 + $0xe0] sm:$0xff]  ;;  %v83_v34 = vld [vmem:[%s1273_s2 + $0xf0] sm:$0xff] }
  0x3e   :  { %888 = vmatprep.subr.bf16.mxu1 %v887_v8  ;;  %473 = vmatprep.mubr.f32.mxu0 %v972_v1  ;;  %v897_v35 = vpack.c.bf16 %v81_v31, %v73_v30  ;;  %v905_v36 = vpack.c.bf16 %v83_v34, %v75_v33  ;;  %v693_v40 = vld [vmem:[#allocation3] sm:$0xff]  ;;  %v743_v44 = vld [vmem:[#allocation5] sm:$0xff] }
  0x3f   :  { %544 = vmatprep.mubr.f32.mxu1 %v972_v1  ;;  %v698_v45 = vrot.slane %v693_v40, %v697_v39  ;;  %v706_v46 = vrot.slane %v693_v40, %v705_v41  ;;  %v702_v47 = vrot.slane %v693_v40, %v701_v42  ;;  %v748_v48 = vrot.slane %v743_v44, %v697_v39 }
  0x40   :  { %882 = vmatpush1.bf16.msra.mxu0 %v881_v14  ;;  %v710_v49 = vrot.slane %v693_v40, %v709_v43  ;;  %v756_v50 = vrot.slane %v743_v44, %v705_v41  ;;  %v752_v51 = vrot.slane %v743_v44, %v701_v42  ;;  %v760_v55 = vrot.slane %v743_v44, %v709_v43 }
  0x41   :  { %890 = vmatpush1.bf16.msra.mxu1 %v889_v15  ;;  %892 = vmatprep.subr.bf16.mxu0 %v891_v16  ;;  %v714_v5 = vrot.slane %v693_v40, %v713_v56  ;;  %v722_v8 = vrot.slane %v693_v40, %v721_v60  ;;  %v718_v9 = vrot.slane %v693_v40, %v717_v61 }
  0x42   :  { %900 = vmatprep.subr.bf16.mxu1 %v899_v20  ;;  %v764_v11 = vrot.slane %v743_v44, %v713_v56  ;;  %v726_v12 = vrot.slane %v693_v40, %v725_v0  ;;  %v768_v15 = vrot.slane %v743_v44, %v717_v61  ;;  %v772_v19 = vrot.slane %v743_v44, %v721_v60  ;;  %v841_v40 = vld [vmem:[#allocation2] ss:$0 sm:$0xff] }
  0x43   :  { %837 = vmatmul.mubr.msk.f32.vlgmr.msra.gmra.mrb[0].mxu0 %vm118_vm0, %v52_v26 }
  0x44   :  { %838 = vmatmul.mubr.msk.f32.vlgmr.msra.gmra.mrb[0].mxu1 %vm118_vm0, %v52_v26  ;;  %894 = vmatpush1.bf16.msra.mxu0 %v893_v27 }
  0x45   :  { %902 = vmatpush1.bf16.msra.mxu1 %v901_v28  ;;  %896 = vmatprep.subr.bf16.mxu0 %v895_v29  ;;  %v776_v28 = vrot.slane %v743_v44, %v725_v0 }
  0x46   :  { %904 = vmatprep.subr.bf16.mxu1 %v903_v32  ;;  %615 = vmatprep.mubr.f32.mxu0 %v972_v1 }
  0x47   :  { %686 = vmatprep.mubr.f32.mxu1 %v972_v1 }
  0x48   :  { %898 = vmatpush1.bf16.msra.mxu0 %v897_v35 }
  0x49   :  { %906 = vmatpush1.bf16.msra.mxu1 %v905_v36 }
  0x4b   :  { %839 = vmatmul.mubr.msk.f32.vlgmr.msra.gmra.mrb[2].mxu0 %vm118_vm0, %v52_v26 }
  0x4c   :  { %840 = vmatmul.mubr.msk.f32.vlgmr.msra.gmra.mrb[2].mxu1 %vm118_vm0, %v52_v26 }
 0x116   :  { %v475_v1 = vpop.f32.mrb[0].mxu0 }
 0x117   :  { %v735_v52 = vadd.f32 %v698_v45, %v475_v1  ;;  %v546_v53 = vpop.f32.mrb[0].mxu1  ;;  %v477_v54 = vpop.f32.mrb[1].mxu0 }
 0x118   :  { %v737_v57 = vadd.f32 %v706_v46, %v546_v53  ;;  %v736_v58 = vadd.f32 %v702_v47, %v477_v54  ;;  %v548_v59 = vpop.f32.mrb[1].mxu1 }
 0x119   :  { %v785_v62 = vmul.f32 %v748_v48, %v735_v52  ;;  %v738_v63 = vadd.f32 %v710_v49, %v548_v59 }
 0x11a   :  { %v787_v2 = vmul.f32 %v756_v50, %v737_v57  ;;  %v786_v3 = vmul.f32 %v752_v51, %v736_v58 }
 0x11b   :  { %v794_v4 = vsel %vm793_vm1, %v785_v62, 0.0  ;;  %v788_v7 = vmul.f32 %v760_v55, %v738_v63 }
 0x11c   :  { %v795_v6 = vsel %vm793_vm1, %v786_v3, 0.0  ;;  %v797_v13 = vsel %vm793_vm1, %v787_v2, 0.0 }
 0x11d   :  { %v796_v10 = vadd.f32 %v795_v6, %v794_v4  ;;  %v799_v21 = vsel %vm793_vm1, %v788_v7, 0.0 }
 0x11e   :  { %v617_v14 = vpop.f32.mrb[2].mxu0 }
 0x11f   :  { %v798_v16 = vadd.f32 %v797_v13, %v796_v10  ;;  %v739_v17 = vadd.f32 %v714_v5, %v617_v14  ;;  %v688_v18 = vpop.f32.mrb[2].mxu1  ;;  %v619_v20 = vpop.f32.mrb[3].mxu0 }
 0x120   :  { %v741_v22 = vadd.f32 %v722_v8, %v688_v18  ;;  %v740_v23 = vadd.f32 %v718_v9, %v619_v20  ;;  %v690_v24 = vpop.f32.mrb[3].mxu1 }
 0x121   :  { %v800_v25 = vadd.f32 %v799_v21, %v798_v16  ;;  %v789_v26 = vmul.f32 %v764_v11, %v739_v17  ;;  %v742_v27 = vadd.f32 %v726_v12, %v690_v24 }
 0x122   :  { %v790_v29 = vmul.f32 %v768_v15, %v740_v23  ;;  %v791_v31 = vmul.f32 %v772_v19, %v741_v22 }
 0x123   :  { %v801_v30 = vsel %vm793_vm1, %v789_v26, 0.0  ;;  %v792_v34 = vmul.f32 %v776_v28, %v742_v27 }
 0x124   :  { %v802_v32 = vadd.f32 %v801_v30, %v800_v25  ;;  %v803_v33 = vsel %vm793_vm1, %v790_v29, 0.0  ;;  %v805_v36 = vsel %vm793_vm1, %v791_v31, 0.0 }
 0x125   :  { %v807_v38 = vsel %vm793_vm1, %v792_v34, 0.0 }
 0x126   :  { %v804_v35 = vadd.f32 %v803_v33, %v802_v32 }
 0x128   :  { %v806_v37 = vadd.f32 %v805_v36, %v804_v35 }
 0x12a   :  { %v808_v39 = vadd.f32 %v807_v38, %v806_v37 }
 0x12c   :  { %809 = vadd.xlane.f32.xlu0 %v808_v39 }
 0x1b9   :  { %v810_v41 = vpop.xlane.xlu0 %809 }
 0x1ba   :  { %v818_v42 = vadd.f32 %v841_v40, %v810_v41 }
 0x1bc   :  { %v842_v43 = vmul.f32 -1.442695, %v818_v42 }
 0x1be   :  { %918 = vpow2.f32 %v842_v43 }
 0x1c8   :  { %v919_v44 = vpop.eup %918 }
 0x1c9   :  { %v822_v45 = vadd.f32 1.0, %v919_v44 }
 0x1cb   :  { %920 = vrcp.f32 %v822_v45 }
 0x1d5   :  { %v921_v46 = vpop.eup %920 }
 0x1d6   :  { %826 = vst.msk [vmem:[%s1278_s7] sm:$0x3] %vm825_vm2, %v921_v46 }
 0x1d7   :  { %831 = vsyncpa [#allocation4], 1 }
 0x1d8   :  { %832 = vsyncpa [#allocation6], 1 }

// kernel: lstm_net_forward.3
= control target key start
LH: loop header
LB: loop body
LE: loop exit
PB: predicated region body
PF: predicated region fallthrough
CT: control target
= control target key end

     0   :  { %13 = vsyncpa [#allocation4], 0  ;;  %s2039_s24 = smov [#allocation3]   ;;  %s2585_s0 = inlined_call_operand.vmem [shape: bf16[8,2,128], index: 0, kind: input, shape index: {}]   ;;  %s2586_s1 = inlined_call_operand.vmem [shape: bf16[8,2,128], index: 1, kind: input, shape index: {}]   ;;  %s2587_s2 = inlined_call_operand.vmem [shape: bf16[32,128], index: 2, kind: input, shape index: {}]   ;;  %s2588_s3 = inlined_call_operand.vmem [shape: bf16[32,128], index: 3, kind: input, shape index: {}]   ;;  %s2589_s4 = inlined_call_operand.hbm [shape: f32[1,128], index: 4, kind: input, shape index: {}]   ;;  %s2590_s5 = inlined_call_operand.vmem [shape: f32[1,128], index: 5, kind: input, shape index: {}]   ;;  %s2591_s6 = inlined_call_operand.vmem [shape: f32[8,2,32], index: 6, kind: output, shape index: {0}]   ;;  %s2592_s7 = inlined_call_operand.vmem [shape: f32[8,2,32], index: 7, kind: output, shape index: {1}]  }
   0x1   :  { %s35_s25 = sshll.u32 %s2039_s24, 4  ;;  %s2015_s28 = scalar_lea.hbm %s2589_s4, 16  ;;  %s36_s25 = int_to_ptr.vmem [resolvable:$true] %s35_s25 }
   0x2   :  { %p2016_p0 = scmp.ne.s32.totalorder %s2589_s4, %s2015_s28  ;;  %p2019_p1 = scmp.lt.u32.totalorder %s2015_s28, %s2589_s4 }
   0x4   :  { %p2021_p2 = pnand %p2019_p1, %p2016_p0 }
   0x6   :  { %2024 = shalt.err (!%p2021_p2)
}
   0x7   :  { %s2025_s10 = scalar_lea.vmem %s36_s25, 16  ;;  %s2029_s11 = scalar_lea.vmem %s36_s25, 32 }
   0x8   :  { %p2026_p3 = scmp.ne.s32.totalorder %s36_s25, %s2025_s10  ;;  %p2030_p4 = scmp.lt.s32.totalorder %s36_s25, %s36_s25 }
   0x9   :  { %p2031_p5 = scmp.lt.s32.totalorder %s2029_s11, %s2025_s10 }
   0xb   :  { %p2032_p6 = por %p2031_p5, %p2030_p4 }
   0xd   :  { %p2033_p7 = pnand %p2032_p6, %p2026_p3 }
   0xf   :  { %2036 = shalt.err (!%p2033_p7)
}
  0x10   :  { %38 = dma.hbm_to_vmem [thread:$0]  %s2589_s4, 16, %s36_s25, [#allocation4]  }
  0x11   :  { %2037 = dma.done.wait [#allocation4], 16  }
  0x12   :  { %2038 = vsyncadd [#allocation4], 4294967280  ;;  %vm75_vm0 = vcmask 254976   ;;  %v2040_v0 = vmov 0.0   ;;  %vm2041_vm1 = vmmov 0   ;;  %v2115_v1 = vld [vmem:[%s2587_s2] sm:$0xff]  }
  0x13   :  { %1747 = vmatprep.subr.bf16.mxu0 %v2040_v0  ;;  %1755 = vmatprep.subr.bf16.mxu1 %v2040_v0  ;;  %76 = vst.msk [vmem:[#allocation2] sm:$0x3] %vm75_vm0, %v2040_v0  ;;  %77 = vst.msk [vmem:[#allocation2 + $0x2] sm:$0x3] %vm75_vm0, %v2040_v0  ;;  %v2120_v2 = vld [vmem:[%s2588_s3] sm:$0xff]   ;;  %v2126_v3 = vld [vmem:[%s2587_s2 + $0x8] sm:$0xff]  }
  0x14   :  { %78 = vst.msk [vmem:[#allocation2 + $0x4] sm:$0x3] %vm75_vm0, %v2040_v0  ;;  %79 = vst.msk [vmem:[#allocation2 + $0x6] sm:$0x3] %vm75_vm0, %v2040_v0  ;;  %1751 = vmatprep.mubr.msk.bf16.mxu0 %vm2041_vm1, %v2040_v0  ;;  %1759 = vmatprep.mubr.msk.bf16.mxu1 %vm2041_vm1, %v2040_v0  ;;  %v2133_v4 = vld [vmem:[%s2588_s3 + $0x8] sm:$0xff]   ;;  %vm119_vm2 = vcmask 261120  }
  0x15   :  { %1748 = vmatpush3.bf16.msra.mxu0 %v2115_v1  ;;  %1756 = vmatpush3.bf16.msra.mxu1 %v2120_v2  ;;  %s2042_s2 = smov 32   ;;  %v97_v11 = vld [vmem:[%s2585_s0] sm:$0x1]  ;;  %v1637_v12 = vld [vmem:[%s2586_s1 + $0x7] sm:$0x1]  ;;  %s2043_s26 = smov 64  }
  0x16   :  { %1749 = vmatprep.subr.bf16.mxu0 %v2040_v0  ;;  %1757 = vmatprep.subr.bf16.mxu1 %v2040_v0  ;;  %v98_v13 = vunpack.c.l.bf16 %v97_v11  ;;  %v2162_v14 = vld [vmem:[#allocation3] ss:$0 sm:$0xff]  ;;  %v201_v15 = vunpack.c.l.bf16 %v1637_v12  ;;  %v2167_v16 = vld [vmem:[%s2590_s5] ss:$0 sm:$0xff]  ;;  %v1645_v61 = vld [vmem:[%s2585_s0 + $0x1] sm:$0x1] }
  0x17   :  { %v329_v62 = vunpack.c.l.bf16 %v1645_v61  ;;  %v1648_v63 = vld [vmem:[%s2586_s1 + $0x6] sm:$0x1]  ;;  %s2045_s12 = smov 96  }
  0x18   :  { %v105_v17 = vadd.f32 %v2162_v14, %v98_v13  ;;  %v208_v18 = vadd.f32 %v2167_v16, %v201_v15 }
  0x19   :  { %1750 = vmatpush3.bf16.msra.mxu0 %v2126_v3  ;;  %1758 = vmatpush3.bf16.msra.mxu1 %v2133_v4 }
  0x1a   :  { %v90_v5 = vld [vmem:[#allocation2] sm:$0x3]  ;;  %v1636_v8 = vld.sshfl [vmem:[#allocation2 + $0x2] sm:$0x3 pattern:$0x76325410]  ;;  %1763 = vmatprep.subr.bf16.mxu0 %v2040_v0  ;;  %1771 = vmatprep.subr.bf16.mxu1 %v2040_v0 }
  0x1b   :  { %v94_v6 = vld [vmem:[#allocation2 + $0x4] sm:$0x3]  ;;  %v106_v7 = vpack.c.bf16 %v90_v5, %v90_v5  ;;  %179 = vrot.lane.b32.xlu1 %v1636_v8, %s2042_s2  ;;  %v1643_v10 = vld.sshfl [vmem:[#allocation2 + $0x6] sm:$0x3 pattern:$0x76325410]  ;;  %v330_v5 = vadd.f32 %v2162_v14, %v329_v62 }
  0x1c   :  { %v209_v9 = vpack.c.bf16 %v94_v6, %v94_v6  ;;  %v405_v6 = vunpack.c.l.bf16 %v1648_v63 }
  0x1d   :  { %1752 = vmatmul.mubr.msk.bf16.vlgmr.msra.gmra.mrb[0].mxu0 %vm119_vm2, %v106_v7 }
  0x1e   :  { %1760 = vmatmul.mubr.msk.bf16.vlgmr.msra.gmra.mrb[0].mxu1 %vm119_vm2, %v209_v9  ;;  %1764 = vmatpush3.bf16.msra.mxu0 %v2115_v1 }
  0x1f   :  { %281 = vrot.lane.b32.xlu1 %v1643_v10, %s2042_s2  ;;  %1772 = vmatpush3.bf16.msra.mxu1 %v2120_v2  ;;  %v406_v10 = vadd.f32 %v2167_v16, %v405_v6 }
  0x20   :  { %1765 = vmatprep.subr.bf16.mxu0 %v2040_v0  ;;  %1767 = vmatprep.mubr.msk.bf16.mxu0 %vm2041_vm1, %v2040_v0 }
  0x21   :  { %1773 = vmatprep.subr.bf16.mxu1 %v2040_v0  ;;  %1775 = vmatprep.mubr.msk.bf16.mxu1 %vm2041_vm1, %v2040_v0 }
  0x22   :  { %1766 = vmatpush3.bf16.msra.mxu0 %v2126_v3 }
  0x23   :  { %1774 = vmatpush3.bf16.msra.mxu1 %v2133_v4  ;;  %1779 = vmatprep.subr.bf16.mxu0 %v2040_v0 }
  0x24   :  { %1787 = vmatprep.subr.bf16.mxu1 %v2040_v0 }
  0x8d   :  { %v180_v43 = vpop.permute.xlu1 %179 }
  0x91   :  { %v282_v45 = vpop.permute.xlu1 %281 }
  0xf0   :  { %v157_v19 = vpop.f32.mrb[0].mxu0 }
  0xf1   :  { %v163_v20 = vadd.f32 %v157_v19, %v105_v17  ;;  %v1753_v21 = vpop.f32.mrb[1].mxu0  ;;  %v259_v22 = vpop.f32.mrb[0].mxu1 }
  0xf2   :  { %v265_v23 = vadd.f32 %v259_v22, %v208_v18  ;;  %v160_v24 = vpop.f32.mrb[2].mxu0  ;;  %v1761_v25 = vpop.f32.mrb[1].mxu1 }
  0xf3   :  { %1886 = vtanh.f32 %v163_v20  ;;  %v1754_v26 = vpop.f32.mrb[3].mxu0  ;;  %v262_v27 = vpop.f32.mrb[2].mxu1  ;;  %v1635_v31 = vmul.f32 -1.442695, %v163_v20 }
  0xf4   :  { %v1762_v28 = vpop.f32.mrb[3].mxu1  ;;  %1888 = vtanh.f32 %v265_v23  ;;  %v1642_v32 = vmul.f32 -1.442695, %v265_v23 }
  0xf5   :  { %1890 = vpow2.f32 %v1635_v31 }
  0xf6   :  { %1892 = vpow2.f32 %v1642_v32 }
  0xfd   :  { %v1887_v29 = vpop.eup %1886 }
  0xfe   :  { %184 = vrot.lane.b32.xlu0 %v1887_v29, %s2043_s26  ;;  %v1889_v30 = vpop.eup %1888 }
  0xff   :  { %v1891_v33 = vpop.eup %1890 }
 0x100   :  { %v167_v34 = vadd.f32 1.0, %v1891_v33  ;;  %v1893_v35 = vpop.eup %1892 }
 0x101   :  { %v269_v36 = vadd.f32 1.0, %v1893_v35 }
 0x102   :  { %286 = vrot.lane.b32.xlu0 %v1889_v30, %s2043_s26  ;;  %1894 = vrcp.f32 %v167_v34 }
 0x103   :  { %1896 = vrcp.f32 %v269_v36 }
 0x10c   :  { %v1895_v37 = vpop.eup %1894 }
 0x10d   :  { %v1897_v40 = vpop.eup %1896  ;;  %v182_v44 = vmul.f32 %v1895_v37, %v180_v43 }
 0x10e   :  { %v284_v48 = vmul.f32 %v1897_v40, %v282_v45 }
 0x170   :  { %v185_v38 = vpop.permute.xlu0 %184 }
 0x171   :  { %v187_v39 = vmul.f32 %v1895_v37, %v185_v38 }
 0x173   :  { %189 = vrot.lane.b32.xlu0 %v187_v39, %s2042_s2 }
 0x174   :  { %v287_v41 = vpop.permute.xlu0 %286 }
 0x175   :  { %v289_v42 = vmul.f32 %v1897_v40, %v287_v41 }
 0x177   :  { %291 = vrot.lane.b32.xlu1 %v289_v42, %s2042_s2 }
 0x1e5   :  { %v190_v46 = vpop.permute.xlu0 %189 }
 0x1e6   :  { %v2175_v47 = vadd.f32 %v190_v46, %v182_v44 }
 0x1e8   :  { %1898 = vtanh.f32 %v2175_v47 }
 0x1e9   :  { %v292_v49 = vpop.permute.xlu1 %291 }
 0x1ea   :  { %v2178_v50 = vadd.f32 %v292_v49, %v284_v48 }
 0x1ec   :  { %1900 = vtanh.f32 %v2178_v50 }
 0x1f2   :  { %v1899_v51 = vpop.eup %1898 }
 0x1f3   :  { %195 = vrot.lane.b32.xlu0 %v1899_v51, %s2043_s26 }
 0x1f6   :  { %v1901_v52 = vpop.eup %1900 }
 0x1f7   :  { %297 = vrot.lane.b32.xlu1 %v1901_v52, %s2043_s26  ;;  %v1656_v52 = vld [vmem:[%s2586_s1 + $0x5] sm:$0x1] }
 0x265   :  { %v196_v53 = vpop.permute.xlu0 %195 }
 0x266   :  { %v2183_v54 = vmul.f32 %v1895_v37, %v196_v53 }
 0x268   :  { %v331_v55 = vpack.c.bf16 %v2183_v54, %v2183_v54 }
 0x269   :  { %v298_v56 = vpop.permute.xlu1 %297 }
 0x26a   :  { %v2187_v57 = vmul.f32 %v1897_v40, %v298_v56  ;;  %333 = vrot.lane.b32.xlu0 %v331_v55, %s2042_s2  ;;  %v583_v55 = vunpack.c.l.bf16 %v1656_v52 }
 0x26c   :  { %v407_v58 = vpack.c.bf16 %v2187_v57, %v2187_v57 }
 0x26e   :  { %409 = vrot.lane.b32.xlu1 %v407_v58, %s2042_s2 }
 0x2dc   :  { %v334_v59 = vpop.permute.xlu0 %333 }
 0x2dd   :  { %1768 = vmatmul.mubr.msk.bf16.vlgmr.msra.gmra.mrb[4].mxu0 %vm119_vm2, %v334_v59 }
 0x2de   :  { %1780 = vmatpush3.bf16.msra.mxu0 %v2115_v1  ;;  %1783 = vmatprep.mubr.msk.bf16.mxu0 %vm2041_vm1, %v2040_v0 }
 0x2df   :  { %1781 = vmatprep.subr.bf16.mxu0 %v2040_v0 }
 0x2e0   :  { %v410_v60 = vpop.permute.xlu1 %409 }
 0x2e1   :  { %1776 = vmatmul.mubr.msk.bf16.vlgmr.msra.gmra.mrb[4].mxu1 %vm119_vm2, %v410_v60  ;;  %v584_v60 = vadd.f32 %v2167_v16, %v583_v55 }
 0x2e2   :  { %1788 = vmatpush3.bf16.msra.mxu1 %v2120_v2  ;;  %1782 = vmatpush3.bf16.msra.mxu0 %v2126_v3 }
 0x2e3   :  { %1789 = vmatprep.subr.bf16.mxu1 %v2040_v0  ;;  %1791 = vmatprep.mubr.msk.bf16.mxu1 %vm2041_vm1, %v2040_v0 }
 0x2e4   :  { %1795 = vmatprep.subr.bf16.mxu0 %v2040_v0 }
 0x2e6   :  { %1790 = vmatpush3.bf16.msra.mxu1 %v2133_v4 }
 0x2e7   :  { %1803 = vmatprep.subr.bf16.mxu1 %v2040_v0 }
 0x3b0   :  { %v372_v7 = vpop.f32.mrb[4].mxu0 }
 0x3b1   :  { %v378_v8 = vadd.f32 %v372_v7, %v330_v5  ;;  %v1769_v9 = vpop.f32.mrb[5].mxu0 }
 0x3b2   :  { %v375_v11 = vpop.f32.mrb[6].mxu0 }
 0x3b3   :  { %1902 = vtanh.f32 %v378_v8  ;;  %v1770_v12 = vpop.f32.mrb[7].mxu0  ;;  %v1647_v22 = vmul.f32 -1.442695, %v378_v8 }
 0x3b4   :  { %v448_v13 = vpop.f32.mrb[4].mxu1 }
 0x3b5   :  { %v454_v15 = vadd.f32 %v448_v13, %v406_v10  ;;  %v1777_v17 = vpop.f32.mrb[5].mxu1 }
 0x3b6   :  { %v451_v18 = vpop.f32.mrb[6].mxu1 }
 0x3b7   :  { %1904 = vtanh.f32 %v454_v15  ;;  %v1778_v19 = vpop.f32.mrb[7].mxu1  ;;  %v1650_v23 = vmul.f32 -1.442695, %v454_v15 }
 0x3b8   :  { %1906 = vpow2.f32 %v1647_v22 }
 0x3b9   :  { %1908 = vpow2.f32 %v1650_v23 }
 0x3bd   :  { %v1903_v20 = vpop.eup %1902 }
 0x3be   :  { %388 = vrot.lane.b32.xlu0 %v1903_v20, %s2043_s26 }
 0x3c1   :  { %v1905_v21 = vpop.eup %1904 }
 0x3c2   :  { %464 = vrot.lane.b32.xlu1 %v1905_v21, %s2043_s26  ;;  %v1907_v24 = vpop.eup %1906 }
 0x3c3   :  { %v382_v25 = vadd.f32 1.0, %v1907_v24  ;;  %v1909_v26 = vpop.eup %1908 }
 0x3c4   :  { %v458_v27 = vadd.f32 1.0, %v1909_v26 }
 0x3c5   :  { %1910 = vrcp.f32 %v382_v25 }
 0x3c6   :  { %1912 = vrcp.f32 %v458_v27 }
 0x3cf   :  { %v1911_v28 = vpop.eup %1910 }
 0x3d0   :  { %v1913_v31 = vpop.eup %1912  ;;  %v386_v34 = vmul.f32 %v1911_v28, %v2175_v47 }
 0x3d1   :  { %v462_v37 = vmul.f32 %v1913_v31, %v2178_v50  ;;  %v1653_v50 = vld [vmem:[%s2585_s0 + $0x2] sm:$0x1] }
 0x3d2   :  { %v507_v51 = vunpack.c.l.bf16 %v1653_v50 }
 0x3d4   :  { %v508_v53 = vadd.f32 %v2162_v14, %v507_v51 }
 0x430   :  { %v389_v29 = vpop.permute.xlu0 %388 }
 0x431   :  { %v391_v30 = vmul.f32 %v1911_v28, %v389_v29 }
 0x433   :  { %393 = vrot.lane.b32.xlu0 %v391_v30, %s2042_s2 }
 0x434   :  { %v465_v32 = vpop.permute.xlu1 %464 }
 0x435   :  { %v467_v33 = vmul.f32 %v1913_v31, %v465_v32 }
 0x437   :  { %469 = vrot.lane.b32.xlu1 %v467_v33, %s2042_s2 }
 0x4a5   :  { %v394_v35 = vpop.permute.xlu0 %393 }
 0x4a6   :  { %v2220_v36 = vadd.f32 %v394_v35, %v386_v34 }
 0x4a8   :  { %1914 = vtanh.f32 %v2220_v36 }
 0x4a9   :  { %v470_v38 = vpop.permute.xlu1 %469 }
 0x4aa   :  { %v2224_v39 = vadd.f32 %v470_v38, %v462_v37 }
 0x4ac   :  { %1916 = vtanh.f32 %v2224_v39 }
 0x4b2   :  { %v1915_v40 = vpop.eup %1914 }
 0x4b3   :  { %399 = vrot.lane.b32.xlu0 %v1915_v40, %s2043_s26 }
 0x4b6   :  { %v1917_v41 = vpop.eup %1916 }
 0x4b7   :  { %475 = vrot.lane.b32.xlu1 %v1917_v41, %s2043_s26  ;;  %v1661_v41 = vld [vmem:[%s2585_s0 + $0x3] sm:$0x1] }
 0x525   :  { %v400_v42 = vpop.permute.xlu0 %399 }
 0x526   :  { %v2229_v43 = vmul.f32 %v1911_v28, %v400_v42  ;;  %v685_v42 = vunpack.c.l.bf16 %v1661_v41 }
 0x528   :  { %v509_v44 = vpack.c.bf16 %v2229_v43, %v2229_v43 }
 0x529   :  { %v476_v45 = vpop.permute.xlu1 %475 }
 0x52a   :  { %v2233_v46 = vmul.f32 %v1913_v31, %v476_v45  ;;  %511 = vrot.lane.b32.xlu0 %v509_v44, %s2042_s2  ;;  %v1664_v44 = vld [vmem:[%s2586_s1 + $0x4] sm:$0x1]  ;;  %v686_v45 = vadd.f32 %v2162_v14, %v685_v42 }
 0x52c   :  { %v585_v47 = vpack.c.bf16 %v2233_v46, %v2233_v46 }
 0x52e   :  { %587 = vrot.lane.b32.xlu1 %v585_v47, %s2042_s2  ;;  %v761_v47 = vunpack.c.l.bf16 %v1664_v44 }
 0x530   :  { %v762_v51 = vadd.f32 %v2167_v16, %v761_v47 }
 0x59c   :  { %v512_v48 = vpop.permute.xlu0 %511 }
 0x59d   :  { %1784 = vmatmul.mubr.msk.bf16.vlgmr.msra.gmra.mrb[8].mxu0 %vm119_vm2, %v512_v48 }
 0x59e   :  { %1796 = vmatpush3.bf16.msra.mxu0 %v2115_v1  ;;  %1799 = vmatprep.mubr.msk.bf16.mxu0 %vm2041_vm1, %v2040_v0 }
 0x59f   :  { %1797 = vmatprep.subr.bf16.mxu0 %v2040_v0 }
 0x5a0   :  { %v588_v49 = vpop.permute.xlu1 %587 }
 0x5a1   :  { %1792 = vmatmul.mubr.msk.bf16.vlgmr.msra.gmra.mrb[8].mxu1 %vm119_vm2, %v588_v49 }
 0x5a2   :  { %1804 = vmatpush3.bf16.msra.mxu1 %v2120_v2  ;;  %1798 = vmatpush3.bf16.msra.mxu0 %v2126_v3 }
 0x5a3   :  { %1805 = vmatprep.subr.bf16.mxu1 %v2040_v0  ;;  %1807 = vmatprep.mubr.msk.bf16.mxu1 %vm2041_vm1, %v2040_v0 }
 0x5a4   :  { %1811 = vmatprep.subr.bf16.mxu0 %v2040_v0 }
 0x5a6   :  { %1806 = vmatpush3.bf16.msra.mxu1 %v2133_v4 }
 0x5a7   :  { %1819 = vmatprep.subr.bf16.mxu1 %v2040_v0 }
 0x670   :  { %v550_v56 = vpop.f32.mrb[8].mxu0 }
 0x671   :  { %v556_v58 = vadd.f32 %v550_v56, %v508_v53  ;;  %v1785_v59 = vpop.f32.mrb[9].mxu0 }
 0x672   :  { %v553_v61 = vpop.f32.mrb[10].mxu0 }
 0x673   :  { %1918 = vtanh.f32 %v556_v58  ;;  %v1786_v62 = vpop.f32.mrb[11].mxu0  ;;  %v1655_v11 = vmul.f32 -1.442695, %v556_v58 }
 0x674   :  { %v626_v63 = vpop.f32.mrb[8].mxu1 }
 0x675   :  { %v632_v5 = vadd.f32 %v626_v63, %v584_v60  ;;  %v1793_v6 = vpop.f32.mrb[9].mxu1 }
 0x676   :  { %v629_v7 = vpop.f32.mrb[10].mxu1 }
 0x677   :  { %1920 = vtanh.f32 %v632_v5  ;;  %v1794_v8 = vpop.f32.mrb[11].mxu1  ;;  %v1658_v12 = vmul.f32 -1.442695, %v632_v5 }
 0x678   :  { %1922 = vpow2.f32 %v1655_v11 }
 0x679   :  { %1924 = vpow2.f32 %v1658_v12 }
 0x67d   :  { %v1919_v9 = vpop.eup %1918 }
 0x67e   :  { %566 = vrot.lane.b32.xlu0 %v1919_v9, %s2043_s26 }
 0x681   :  { %v1921_v10 = vpop.eup %1920 }
 0x682   :  { %642 = vrot.lane.b32.xlu1 %v1921_v10, %s2043_s26  ;;  %v1923_v13 = vpop.eup %1922 }
 0x683   :  { %v560_v15 = vadd.f32 1.0, %v1923_v13  ;;  %v1925_v17 = vpop.eup %1924 }
 0x684   :  { %v636_v18 = vadd.f32 1.0, %v1925_v17 }
 0x685   :  { %1926 = vrcp.f32 %v560_v15 }
 0x686   :  { %1928 = vrcp.f32 %v636_v18 }
 0x68f   :  { %v1927_v19 = vpop.eup %1926 }
 0x690   :  { %v1929_v22 = vpop.eup %1928  ;;  %v564_v25 = vmul.f32 %v1927_v19, %v2220_v36 }
 0x691   :  { %v640_v28 = vmul.f32 %v1929_v22, %v2224_v39 }
 0x6f0   :  { %v567_v20 = vpop.permute.xlu0 %566 }
 0x6f1   :  { %v569_v21 = vmul.f32 %v1927_v19, %v567_v20 }
 0x6f3   :  { %571 = vrot.lane.b32.xlu0 %v569_v21, %s2042_s2 }
 0x6f4   :  { %v643_v23 = vpop.permute.xlu1 %642 }
 0x6f5   :  { %v645_v24 = vmul.f32 %v1929_v22, %v643_v23 }
 0x6f7   :  { %647 = vrot.lane.b32.xlu1 %v645_v24, %s2042_s2 }
 0x765   :  { %v572_v26 = vpop.permute.xlu0 %571 }
 0x766   :  { %v2266_v27 = vadd.f32 %v572_v26, %v564_v25 }
 0x768   :  { %1930 = vtanh.f32 %v2266_v27 }
 0x769   :  { %v648_v29 = vpop.permute.xlu1 %647 }
 0x76a   :  { %v2270_v30 = vadd.f32 %v648_v29, %v640_v28 }
 0x76c   :  { %1932 = vtanh.f32 %v2270_v30 }
 0x772   :  { %v1931_v31 = vpop.eup %1930 }
 0x773   :  { %577 = vrot.lane.b32.xlu0 %v1931_v31, %s2043_s26 }
 0x776   :  { %v1933_v32 = vpop.eup %1932 }
 0x777   :  { %653 = vrot.lane.b32.xlu1 %v1933_v32, %s2043_s26 }
 0x7e5   :  { %v578_v33 = vpop.permute.xlu0 %577 }
 0x7e6   :  { %v2275_v34 = vmul.f32 %v1927_v19, %v578_v33 }
 0x7e8   :  { %v687_v35 = vpack.c.bf16 %v2275_v34, %v2275_v34 }
 0x7e9   :  { %v654_v36 = vpop.permute.xlu1 %653 }
 0x7ea   :  { %v2279_v37 = vmul.f32 %v1929_v22, %v654_v36  ;;  %689 = vrot.lane.b32.xlu0 %v687_v35, %s2042_s2  ;;  %v1669_v35 = vld [vmem:[%s2585_s0 + $0x4] sm:$0x1] }
 0x7eb   :  { %v863_v36 = vunpack.c.l.bf16 %v1669_v35 }
 0x7ec   :  { %v763_v38 = vpack.c.bf16 %v2279_v37, %v2279_v37 }
 0x7ee   :  { %765 = vrot.lane.b32.xlu1 %v763_v38, %s2042_s2  ;;  %v1672_v38 = vld [vmem:[%s2586_s1 + $0x3] sm:$0x1] }
 0x85c   :  { %v690_v39 = vpop.permute.xlu0 %689 }
 0x85d   :  { %1800 = vmatmul.mubr.msk.bf16.vlgmr.msra.gmra.mrb[12].mxu0 %vm119_vm2, %v690_v39  ;;  %v864_v39 = vadd.f32 %v2162_v14, %v863_v36 }
 0x85e   :  { %1812 = vmatpush3.bf16.msra.mxu0 %v2115_v1  ;;  %1815 = vmatprep.mubr.msk.bf16.mxu0 %vm2041_vm1, %v2040_v0 }
 0x85f   :  { %1813 = vmatprep.subr.bf16.mxu0 %v2040_v0 }
 0x860   :  { %v766_v40 = vpop.permute.xlu1 %765 }
 0x861   :  { %1808 = vmatmul.mubr.msk.bf16.vlgmr.msra.gmra.mrb[12].mxu1 %vm119_vm2, %v766_v40  ;;  %v939_v40 = vunpack.c.l.bf16 %v1672_v38 }
 0x862   :  { %1820 = vmatpush3.bf16.msra.mxu1 %v2120_v2  ;;  %1814 = vmatpush3.bf16.msra.mxu0 %v2126_v3 }
 0x863   :  { %1821 = vmatprep.subr.bf16.mxu1 %v2040_v0  ;;  %1823 = vmatprep.mubr.msk.bf16.mxu1 %vm2041_vm1, %v2040_v0 }
 0x864   :  { %1827 = vmatprep.subr.bf16.mxu0 %v2040_v0 }
 0x866   :  { %1822 = vmatpush3.bf16.msra.mxu1 %v2133_v4 }
 0x867   :  { %1835 = vmatprep.subr.bf16.mxu1 %v2040_v0 }
 0x930   :  { %v728_v48 = vpop.f32.mrb[12].mxu0 }
 0x931   :  { %v734_v49 = vadd.f32 %v728_v48, %v686_v45  ;;  %v1801_v50 = vpop.f32.mrb[13].mxu0  ;;  %v940_v45 = vadd.f32 %v2167_v16, %v939_v40 }
 0x932   :  { %v731_v52 = vpop.f32.mrb[14].mxu0 }
 0x933   :  { %1934 = vtanh.f32 %v734_v49  ;;  %v1802_v53 = vpop.f32.mrb[15].mxu0  ;;  %v1663_v63 = vmul.f32 -1.442695, %v734_v49 }
 0x934   :  { %v804_v55 = vpop.f32.mrb[12].mxu1 }
 0x935   :  { %v810_v56 = vadd.f32 %v804_v55, %v762_v51  ;;  %v1809_v58 = vpop.f32.mrb[13].mxu1 }
 0x936   :  { %v807_v59 = vpop.f32.mrb[14].mxu1 }
 0x937   :  { %1936 = vtanh.f32 %v810_v56  ;;  %v1810_v60 = vpop.f32.mrb[15].mxu1  ;;  %v1666_v5 = vmul.f32 -1.442695, %v810_v56 }
 0x938   :  { %1938 = vpow2.f32 %v1663_v63 }
 0x939   :  { %1940 = vpow2.f32 %v1666_v5 }
 0x93d   :  { %v1935_v61 = vpop.eup %1934 }
 0x93e   :  { %744 = vrot.lane.b32.xlu0 %v1935_v61, %s2043_s26 }
 0x941   :  { %v1937_v62 = vpop.eup %1936 }
 0x942   :  { %820 = vrot.lane.b32.xlu1 %v1937_v62, %s2043_s26  ;;  %v1939_v6 = vpop.eup %1938 }
 0x943   :  { %v738_v7 = vadd.f32 1.0, %v1939_v6  ;;  %v1941_v8 = vpop.eup %1940 }
 0x944   :  { %v814_v9 = vadd.f32 1.0, %v1941_v8 }
 0x945   :  { %1942 = vrcp.f32 %v738_v7 }
 0x946   :  { %1944 = vrcp.f32 %v814_v9 }
 0x94f   :  { %v1943_v10 = vpop.eup %1942 }
 0x950   :  { %v1945_v13 = vpop.eup %1944  ;;  %v742_v18 = vmul.f32 %v1943_v10, %v2266_v27 }
 0x951   :  { %v818_v21 = vmul.f32 %v1945_v13, %v2270_v30 }
 0x9b0   :  { %v745_v11 = vpop.permute.xlu0 %744 }
 0x9b1   :  { %v747_v12 = vmul.f32 %v1943_v10, %v745_v11 }
 0x9b3   :  { %749 = vrot.lane.b32.xlu0 %v747_v12, %s2042_s2 }
 0x9b4   :  { %v821_v15 = vpop.permute.xlu1 %820 }
 0x9b5   :  { %v823_v17 = vmul.f32 %v1945_v13, %v821_v15 }
 0x9b7   :  { %825 = vrot.lane.b32.xlu1 %v823_v17, %s2042_s2 }
 0xa25   :  { %v750_v19 = vpop.permute.xlu0 %749 }
 0xa26   :  { %v2312_v20 = vadd.f32 %v750_v19, %v742_v18 }
 0xa28   :  { %1946 = vtanh.f32 %v2312_v20 }
 0xa29   :  { %v826_v22 = vpop.permute.xlu1 %825 }
 0xa2a   :  { %v2316_v23 = vadd.f32 %v826_v22, %v818_v21 }
 0xa2c   :  { %1948 = vtanh.f32 %v2316_v23 }
 0xa32   :  { %v1947_v24 = vpop.eup %1946 }
 0xa33   :  { %755 = vrot.lane.b32.xlu0 %v1947_v24, %s2043_s26 }
 0xa36   :  { %v1949_v25 = vpop.eup %1948 }
 0xa37   :  { %831 = vrot.lane.b32.xlu1 %v1949_v25, %s2043_s26 }
 0xaa5   :  { %v756_v26 = vpop.permute.xlu0 %755 }
 0xaa6   :  { %v2321_v27 = vmul.f32 %v1943_v10, %v756_v26 }
 0xaa8   :  { %v865_v28 = vpack.c.bf16 %v2321_v27, %v2321_v27 }
 0xaa9   :  { %v832_v29 = vpop.permute.xlu1 %831 }
 0xaaa   :  { %v2325_v31 = vmul.f32 %v1945_v13, %v832_v29  ;;  %867 = vrot.lane.b32.xlu0 %v865_v28, %s2042_s2 }
 0xaac   :  { %v941_v30 = vpack.c.bf16 %v2325_v31, %v2325_v31 }
 0xaae   :  { %943 = vrot.lane.b32.xlu1 %v941_v30, %s2042_s2  ;;  %v1677_v30 = vld [vmem:[%s2585_s0 + $0x5] sm:$0x1] }
 0xb1c   :  { %v868_v32 = vpop.permute.xlu0 %867 }
 0xb1d   :  { %1816 = vmatmul.mubr.msk.bf16.vlgmr.msra.gmra.mrb[16].mxu0 %vm119_vm2, %v868_v32  ;;  %v1041_v32 = vunpack.c.l.bf16 %v1677_v30  ;;  %v1688_v30 = vld [vmem:[%s2586_s1 + $0x1] sm:$0x1] }
 0xb1e   :  { %1828 = vmatpush3.bf16.msra.mxu0 %v2115_v1  ;;  %1831 = vmatprep.mubr.msk.bf16.mxu0 %vm2041_vm1, %v2040_v0 }
 0xb1f   :  { %1829 = vmatprep.subr.bf16.mxu0 %v2040_v0  ;;  %v1042_v35 = vadd.f32 %v2162_v14, %v1041_v32  ;;  %v1295_v32 = vunpack.c.l.bf16 %v1688_v30 }
 0xb20   :  { %v944_v33 = vpop.permute.xlu1 %943 }
 0xb21   :  { %1824 = vmatmul.mubr.msk.bf16.vlgmr.msra.gmra.mrb[16].mxu1 %vm119_vm2, %v944_v33  ;;  %v1680_v33 = vld [vmem:[%s2586_s1 + $0x2] sm:$0x1] }
 0xb22   :  { %1836 = vmatpush3.bf16.msra.mxu1 %v2120_v2  ;;  %1830 = vmatpush3.bf16.msra.mxu0 %v2126_v3  ;;  %v1117_v36 = vunpack.c.l.bf16 %v1680_v33 }
 0xb23   :  { %1837 = vmatprep.subr.bf16.mxu1 %v2040_v0  ;;  %1839 = vmatprep.mubr.msk.bf16.mxu1 %vm2041_vm1, %v2040_v0 }
 0xb24   :  { %1843 = vmatprep.subr.bf16.mxu0 %v2040_v0 }
 0xb26   :  { %1838 = vmatpush3.bf16.msra.mxu1 %v2133_v4 }
 0xb27   :  { %1851 = vmatprep.subr.bf16.mxu1 %v2040_v0 }
 0xbf0   :  { %v906_v41 = vpop.f32.mrb[16].mxu0 }
 0xbf1   :  { %v912_v42 = vadd.f32 %v906_v41, %v864_v39  ;;  %v1817_v44 = vpop.f32.mrb[17].mxu0  ;;  %v1118_v41 = vadd.f32 %v2167_v16, %v1117_v36  ;;  %v1296_v36 = vadd.f32 %v2167_v16, %v1295_v32 }
 0xbf2   :  { %v909_v47 = vpop.f32.mrb[18].mxu0 }
 0xbf3   :  { %1950 = vtanh.f32 %v912_v42  ;;  %v1818_v48 = vpop.f32.mrb[19].mxu0  ;;  %v1671_v58 = vmul.f32 -1.442695, %v912_v42 }
 0xbf4   :  { %v982_v49 = vpop.f32.mrb[16].mxu1 }
 0xbf5   :  { %v988_v50 = vadd.f32 %v982_v49, %v940_v45  ;;  %v1825_v51 = vpop.f32.mrb[17].mxu1 }
 0xbf6   :  { %v985_v52 = vpop.f32.mrb[18].mxu1 }
 0xbf7   :  { %1952 = vtanh.f32 %v988_v50  ;;  %v1826_v53 = vpop.f32.mrb[19].mxu1  ;;  %v1674_v59 = vmul.f32 -1.442695, %v988_v50 }
 0xbf8   :  { %1954 = vpow2.f32 %v1671_v58 }
 0xbf9   :  { %1956 = vpow2.f32 %v1674_v59 }
 0xbfd   :  { %v1951_v55 = vpop.eup %1950 }
 0xbfe   :  { %922 = vrot.lane.b32.xlu0 %v1951_v55, %s2043_s26 }
 0xc01   :  { %v1953_v56 = vpop.eup %1952 }
 0xc02   :  { %998 = vrot.lane.b32.xlu1 %v1953_v56, %s2043_s26  ;;  %v1955_v60 = vpop.eup %1954 }
 0xc03   :  { %v916_v61 = vadd.f32 1.0, %v1955_v60  ;;  %v1957_v62 = vpop.eup %1956 }
 0xc04   :  { %v992_v63 = vadd.f32 1.0, %v1957_v62 }
 0xc05   :  { %1958 = vrcp.f32 %v916_v61 }
 0xc06   :  { %1960 = vrcp.f32 %v992_v63 }
 0xc0f   :  { %v1959_v5 = vpop.eup %1958 }
 0xc10   :  { %v1961_v8 = vpop.eup %1960  ;;  %v920_v11 = vmul.f32 %v1959_v5, %v2312_v20 }
 0xc11   :  { %v996_v15 = vmul.f32 %v1961_v8, %v2316_v23 }
 0xc70   :  { %v923_v6 = vpop.permute.xlu0 %922 }
 0xc71   :  { %v925_v7 = vmul.f32 %v1959_v5, %v923_v6 }
 0xc73   :  { %927 = vrot.lane.b32.xlu0 %v925_v7, %s2042_s2 }
 0xc74   :  { %v999_v9 = vpop.permute.xlu1 %998 }
 0xc75   :  { %v1001_v10 = vmul.f32 %v1961_v8, %v999_v9 }
 0xc77   :  { %1003 = vrot.lane.b32.xlu1 %v1001_v10, %s2042_s2 }
 0xce5   :  { %v928_v12 = vpop.permute.xlu0 %927 }
 0xce6   :  { %v2358_v13 = vadd.f32 %v928_v12, %v920_v11 }
 0xce8   :  { %1962 = vtanh.f32 %v2358_v13 }
 0xce9   :  { %v1004_v17 = vpop.permute.xlu1 %1003 }
 0xcea   :  { %v2362_v18 = vadd.f32 %v1004_v17, %v996_v15 }
 0xcec   :  { %1964 = vtanh.f32 %v2362_v18 }
 0xcf2   :  { %v1963_v19 = vpop.eup %1962 }
 0xcf3   :  { %933 = vrot.lane.b32.xlu0 %v1963_v19, %s2043_s26 }
 0xcf6   :  { %v1965_v21 = vpop.eup %1964 }
 0xcf7   :  { %1009 = vrot.lane.b32.xlu1 %v1965_v21, %s2043_s26 }
 0xd65   :  { %v934_v22 = vpop.permute.xlu0 %933 }
 0xd66   :  { %v2367_v20 = vmul.f32 %v1959_v5, %v934_v22 }
 0xd68   :  { %v1043_v24 = vpack.c.bf16 %v2367_v20, %v2367_v20 }
 0xd69   :  { %v1010_v25 = vpop.permute.xlu1 %1009 }
 0xd6a   :  { %v2371_v26 = vmul.f32 %v1961_v8, %v1010_v25  ;;  %1045 = vrot.lane.b32.xlu0 %v1043_v24, %s2042_s2 }
 0xd6c   :  { %v1119_v23 = vpack.c.bf16 %v2371_v26, %v2371_v26 }
 0xd6e   :  { %1121 = vrot.lane.b32.xlu1 %v1119_v23, %s2042_s2 }
 0xddc   :  { %v1046_v28 = vpop.permute.xlu0 %1045 }
 0xddd   :  { %1832 = vmatmul.mubr.msk.bf16.vlgmr.msra.gmra.mrb[20].mxu0 %vm119_vm2, %v1046_v28 }
 0xdde   :  { %1844 = vmatpush3.bf16.msra.mxu0 %v2115_v1  ;;  %1847 = vmatprep.mubr.msk.bf16.mxu0 %vm2041_vm1, %v2040_v0 }
 0xddf   :  { %1845 = vmatprep.subr.bf16.mxu0 %v2040_v0 }
 0xde0   :  { %v1122_v29 = vpop.permute.xlu1 %1121 }
 0xde1   :  { %1840 = vmatmul.mubr.msk.bf16.vlgmr.msra.gmra.mrb[20].mxu1 %vm119_vm2, %v1122_v29 }
 0xde2   :  { %1852 = vmatpush3.bf16.msra.mxu1 %v2120_v2  ;;  %1846 = vmatpush3.bf16.msra.mxu0 %v2126_v3 }
 0xde3   :  { %1853 = vmatprep.subr.bf16.mxu1 %v2040_v0  ;;  %1855 = vmatprep.mubr.msk.bf16.mxu1 %vm2041_vm1, %v2040_v0 }
 0xde4   :  { %1859 = vmatprep.subr.bf16.mxu0 %v2040_v0 }
 0xde6   :  { %1854 = vmatpush3.bf16.msra.mxu1 %v2133_v4 }
 0xde7   :  { %1867 = vmatprep.subr.bf16.mxu1 %v2040_v0 }
 0xeb0   :  { %v1084_v38 = vpop.f32.mrb[20].mxu0 }
 0xeb1   :  { %v1090_v39 = vadd.f32 %v1084_v38, %v1042_v35  ;;  %v1833_v40 = vpop.f32.mrb[21].mxu0 }
 0xeb2   :  { %v1087_v42 = vpop.f32.mrb[22].mxu0 }
 0xeb3   :  { %1966 = vtanh.f32 %v1090_v39  ;;  %v1834_v44 = vpop.f32.mrb[23].mxu0  ;;  %v1679_v53 = vmul.f32 -1.442695, %v1090_v39 }
 0xeb4   :  { %v1160_v45 = vpop.f32.mrb[20].mxu1 }
 0xeb5   :  { %v1166_v47 = vadd.f32 %v1160_v45, %v1118_v41  ;;  %v1841_v48 = vpop.f32.mrb[21].mxu1 }
 0xeb6   :  { %v1163_v49 = vpop.f32.mrb[22].mxu1 }
 0xeb7   :  { %1968 = vtanh.f32 %v1166_v47  ;;  %v1842_v50 = vpop.f32.mrb[23].mxu1  ;;  %v1682_v55 = vmul.f32 -1.442695, %v1166_v47 }
 0xeb8   :  { %1970 = vpow2.f32 %v1679_v53 }
 0xeb9   :  { %1972 = vpow2.f32 %v1682_v55 }
 0xebd   :  { %v1967_v51 = vpop.eup %1966 }
 0xebe   :  { %1100 = vrot.lane.b32.xlu0 %v1967_v51, %s2043_s26 }
 0xec1   :  { %v1969_v52 = vpop.eup %1968 }
 0xec2   :  { %1176 = vrot.lane.b32.xlu1 %v1969_v52, %s2043_s26  ;;  %v1971_v56 = vpop.eup %1970 }
 0xec3   :  { %v1094_v58 = vadd.f32 1.0, %v1971_v56  ;;  %v1973_v59 = vpop.eup %1972 }
 0xec4   :  { %v1170_v60 = vadd.f32 1.0, %v1973_v59 }
 0xec5   :  { %1974 = vrcp.f32 %v1094_v58 }
 0xec6   :  { %1976 = vrcp.f32 %v1170_v60 }
 0xecf   :  { %v1975_v61 = vpop.eup %1974 }
 0xed0   :  { %v1977_v5 = vpop.eup %1976  ;;  %v1098_v8 = vmul.f32 %v1975_v61, %v2358_v13 }
 0xed1   :  { %v1174_v11 = vmul.f32 %v1977_v5, %v2362_v18 }
 0xf30   :  { %v1101_v62 = vpop.permute.xlu0 %1100 }
 0xf31   :  { %v1103_v63 = vmul.f32 %v1975_v61, %v1101_v62 }
 0xf33   :  { %1105 = vrot.lane.b32.xlu0 %v1103_v63, %s2042_s2 }
 0xf34   :  { %v1177_v6 = vpop.permute.xlu1 %1176 }
 0xf35   :  { %v1179_v7 = vmul.f32 %v1977_v5, %v1177_v6 }
 0xf37   :  { %1181 = vrot.lane.b32.xlu1 %v1179_v7, %s2042_s2 }
 0xfa5   :  { %v1106_v9 = vpop.permute.xlu0 %1105 }
 0xfa6   :  { %v2404_v10 = vadd.f32 %v1106_v9, %v1098_v8 }
 0xfa8   :  { %1978 = vtanh.f32 %v2404_v10 }
 0xfa9   :  { %v1182_v12 = vpop.permute.xlu1 %1181 }
 0xfaa   :  { %v2408_v15 = vadd.f32 %v1182_v12, %v1174_v11 }
 0xfac   :  { %1980 = vtanh.f32 %v2408_v15 }
 0xfb2   :  { %v1979_v17 = vpop.eup %1978 }
 0xfb3   :  { %1111 = vrot.lane.b32.xlu0 %v1979_v17, %s2043_s26 }
 0xfb6   :  { %v1981_v19 = vpop.eup %1980 }
 0xfb7   :  { %1187 = vrot.lane.b32.xlu1 %v1981_v19, %s2043_s26 }
0x1025   :  { %v1112_v21 = vpop.permute.xlu0 %1111 }
0x1026   :  { %v2413_v13 = vmul.f32 %v1975_v61, %v1112_v21 }
0x1028   :  { %v1221_v22 = vpack.c.bf16 %v2413_v13, %v2413_v13 }
0x1029   :  { %v1188_v24 = vpop.permute.xlu1 %1187 }
0x102a   :  { %v2417_v25 = vmul.f32 %v1977_v5, %v1188_v24  ;;  %1223 = vrot.lane.b32.xlu0 %v1221_v22, %s2042_s2  ;;  %v1693_v22 = vld [vmem:[%s2585_s0 + $0x7] sm:$0x1] }
0x102b   :  { %v1397_v24 = vunpack.c.l.bf16 %v1693_v22 }
0x102c   :  { %v1297_v18 = vpack.c.bf16 %v2417_v25, %v2417_v25 }
0x102e   :  { %1299 = vrot.lane.b32.xlu1 %v1297_v18, %s2042_s2  ;;  %v1471_v18 = vld [vmem:[%s2586_s1] sm:$0x1] }
0x109c   :  { %v1224_v23 = vpop.permute.xlu0 %1223 }
0x109d   :  { %1848 = vmatmul.mubr.msk.bf16.vlgmr.msra.gmra.mrb[24].mxu0 %vm119_vm2, %v1224_v23  ;;  %v1398_v23 = vadd.f32 %v2162_v14, %v1397_v24 }
0x109e   :  { %1860 = vmatpush3.bf16.msra.mxu0 %v2115_v1  ;;  %1863 = vmatprep.mubr.msk.bf16.mxu0 %vm2041_vm1, %v2040_v0  ;;  %v1685_v1 = vld [vmem:[%s2585_s0 + $0x6] sm:$0x1] }
0x109f   :  { %1861 = vmatprep.subr.bf16.mxu0 %v2040_v0  ;;  %v1219_v29 = vunpack.c.l.bf16 %v1685_v1 }
0x10a0   :  { %v1300_v28 = vpop.permute.xlu1 %1299 }
0x10a1   :  { %1856 = vmatmul.mubr.msk.bf16.vlgmr.msra.gmra.mrb[24].mxu1 %vm119_vm2, %v1300_v28  ;;  %v1472_v28 = vunpack.c.l.bf16 %v1471_v18 }
0x10a2   :  { %1868 = vmatpush3.bf16.msra.mxu1 %v2120_v2  ;;  %1862 = vmatpush3.bf16.msra.mxu0 %v2126_v3  ;;  %v1220_v2 = vadd.f32 %v2162_v14, %v1219_v29 }
0x10a3   :  { %1869 = vmatprep.subr.bf16.mxu1 %v2040_v0  ;;  %1871 = vmatprep.mubr.msk.bf16.mxu1 %vm2041_vm1, %v2040_v0 }
0x10a6   :  { %1870 = vmatpush3.bf16.msra.mxu1 %v2133_v4 }
0x1170   :  { %v1262_v3 = vpop.f32.mrb[24].mxu0 }
0x1171   :  { %v1268_v33 = vadd.f32 %v1262_v3, %v1220_v2  ;;  %v1849_v35 = vpop.f32.mrb[25].mxu0  ;;  %v2014_v2 = vld [vmem:[%s2590_s5] ss:$0 sm:$0xff] }
0x1172   :  { %v1265_v0 = vpop.f32.mrb[26].mxu0  ;;  %v1473_v32 = vadd.f32 %v2014_v2, %v1472_v28 }
0x1173   :  { %1982 = vtanh.f32 %v1268_v33  ;;  %v1850_v4 = vpop.f32.mrb[27].mxu0  ;;  %v1687_v47 = vmul.f32 -1.442695, %v1268_v33 }
0x1174   :  { %v1338_v38 = vpop.f32.mrb[24].mxu1 }
0x1175   :  { %v1344_v39 = vadd.f32 %v1338_v38, %v1296_v36  ;;  %v1857_v40 = vpop.f32.mrb[25].mxu1 }
0x1176   :  { %v1341_v41 = vpop.f32.mrb[26].mxu1 }
0x1177   :  { %1984 = vtanh.f32 %v1344_v39  ;;  %v1858_v42 = vpop.f32.mrb[27].mxu1  ;;  %v1690_v48 = vmul.f32 -1.442695, %v1344_v39 }
0x1178   :  { %1986 = vpow2.f32 %v1687_v47 }
0x1179   :  { %1988 = vpow2.f32 %v1690_v48 }
0x117d   :  { %v1983_v44 = vpop.eup %1982 }
0x117e   :  { %1278 = vrot.lane.b32.xlu0 %v1983_v44, %s2043_s26 }
0x1181   :  { %v1985_v45 = vpop.eup %1984 }
0x1182   :  { %1354 = vrot.lane.b32.xlu1 %v1985_v45, %s2043_s26  ;;  %v1987_v16 = vpop.eup %1986 }
0x1183   :  { %v1272_v49 = vadd.f32 1.0, %v1987_v16  ;;  %v1989_v50 = vpop.eup %1988 }
0x1184   :  { %v1348_v51 = vadd.f32 1.0, %v1989_v50 }
0x1185   :  { %1990 = vrcp.f32 %v1272_v49 }
0x1186   :  { %1992 = vrcp.f32 %v1348_v51 }
0x118f   :  { %v1991_v52 = vpop.eup %1990 }
0x1190   :  { %v1993_v56 = vpop.eup %1992  ;;  %v1276_v60 = vmul.f32 %v1991_v52, %v2404_v10 }
0x1191   :  { %v1352_v63 = vmul.f32 %v1993_v56, %v2408_v15 }
0x11f0   :  { %v1279_v53 = vpop.permute.xlu0 %1278 }
0x11f1   :  { %v1281_v55 = vmul.f32 %v1991_v52, %v1279_v53 }
0x11f3   :  { %1283 = vrot.lane.b32.xlu0 %v1281_v55, %s2042_s2 }
0x11f4   :  { %v1355_v58 = vpop.permute.xlu1 %1354 }
0x11f5   :  { %v1357_v59 = vmul.f32 %v1993_v56, %v1355_v58 }
0x11f7   :  { %1359 = vrot.lane.b32.xlu1 %v1357_v59, %s2042_s2  ;;  %v2044_v59 = vmov 1983009808  }
0x1265   :  { %v1284_v61 = vpop.permute.xlu0 %1283 }
0x1266   :  { %v2448_v62 = vadd.f32 %v1284_v61, %v1276_v60  ;;  %v303_v60 = vunpack.c.l.s4 %v2044_v59  ;;  %v305_v61 = vlaneseq }
0x1268   :  { %1994 = vtanh.f32 %v2448_v62 }
0x1269   :  { %v1360_v5 = vpop.permute.xlu1 %1359 }
0x126a   :  { %v2452_v6 = vadd.f32 %v1360_v5, %v1352_v63 }
0x126c   :  { %1996 = vtanh.f32 %v2452_v6 }
0x1272   :  { %v1995_v7 = vpop.eup %1994 }
0x1273   :  { %1289 = vrot.lane.b32.xlu0 %v1995_v7, %s2043_s26  ;;  %v304_v7 = vunpack.c.0.s8 %v303_v60 }
0x1276   :  { %v1997_v8 = vpop.eup %1996 }
0x1277   :  { %1365 = vrot.lane.b32.xlu1 %v1997_v8, %s2043_s26  ;;  %v306_v8 = vshrl.u32 %v305_v61, 7 }
0x12e5   :  { %v1290_v9 = vpop.permute.xlu0 %1289 }
0x12e6   :  { %v2457_v10 = vmul.f32 %v1991_v52, %v1290_v9  ;;  %v307_v9 = vsub.s32 %v304_v7, %v306_v8 }
0x12e8   :  { %v1399_v11 = vpack.c.bf16 %v2457_v10, %v2457_v10  ;;  %v842_v22 = vrot.slane %v2321_v27, %v307_v9  ;;  %v1376_v27 = vrot.slane %v2457_v10, %v307_v9 }
0x12e9   :  { %v1366_v12 = vpop.permute.xlu1 %1365 }
0x12ea   :  { %v2461_v17 = vmul.f32 %v1993_v56, %v1366_v12  ;;  %1401 = vrot.lane.b32.xlu0 %v1399_v11, %s2042_s2  ;;  %v308_v12 = vrot.slane %v2183_v54, %v307_v9  ;;  %v677_v54 = vrot.slane %v2279_v37, %v307_v9  ;;  %v1211_v37 = vrot.slane %v2417_v25, %v307_v9 }
0x12ec   :  { %v1474_v15 = vpack.c.bf16 %v2461_v17, %v2461_v17 }
0x12ee   :  { %1476 = vrot.lane.b32.xlu1 %v1474_v15, %s2042_s2  ;;  %v486_v15 = vrot.slane %v2229_v43, %v307_v9  ;;  %v1020_v43 = vrot.slane %v2367_v20, %v307_v9 }
0x135c   :  { %v1402_v19 = vpop.permute.xlu0 %1401 }
0x135d   :  { %1864 = vmatmul.mubr.msk.bf16.vlgmr.msra.gmra.mrb[28].mxu0 %vm119_vm2, %v1402_v19  ;;  %v499_v19 = vrot.slane %v2233_v46, %v307_v9  ;;  %v1033_v46 = vrot.slane %v2371_v26, %v307_v9 }
0x1360   :  { %v1477_v21 = vpop.permute.xlu1 %1476 }
0x1361   :  { %1872 = vmatmul.mubr.msk.bf16.vlgmr.msra.gmra.mrb[28].mxu1 %vm119_vm2, %v1477_v21  ;;  %v664_v21 = vrot.slane %v2275_v34, %v307_v9  ;;  %v1198_v34 = vrot.slane %v2413_v13, %v307_v9 }
0x1430   :  { %v1440_v1 = vpop.f32.mrb[28].mxu0 }
0x1431   :  { %v1446_v29 = vadd.f32 %v1440_v1, %v1398_v23  ;;  %v1865_v30 = vpop.f32.mrb[29].mxu0 }
0x1432   :  { %v1443_v3 = vpop.f32.mrb[30].mxu0 }
0x1433   :  { %1998 = vtanh.f32 %v1446_v29  ;;  %v1866_v33 = vpop.f32.mrb[31].mxu0  ;;  %v1695_v40 = vmul.f32 -1.442695, %v1446_v29 }
0x1434   :  { %v1515_v35 = vpop.f32.mrb[28].mxu1 }
0x1435   :  { %v1521_v36 = vadd.f32 %v1515_v35, %v1473_v32  ;;  %v1873_v0 = vpop.f32.mrb[29].mxu1 }
0x1436   :  { %v1518_v4 = vpop.f32.mrb[30].mxu1 }
0x1437   :  { %2000 = vtanh.f32 %v1521_v36  ;;  %v1874_v38 = vpop.f32.mrb[31].mxu1  ;;  %v1697_v41 = vmul.f32 -1.442695, %v1521_v36 }
0x1438   :  { %2002 = vpow2.f32 %v1695_v40 }
0x1439   :  { %2004 = vpow2.f32 %v1697_v41 }
0x143d   :  { %v1999_v39 = vpop.eup %1998 }
0x143e   :  { %1456 = vrot.lane.b32.xlu0 %v1999_v39, %s2043_s26 }
0x1441   :  { %v2001_v14 = vpop.eup %2000 }
0x1442   :  { %1531 = vrot.lane.b32.xlu1 %v2001_v14, %s2043_s26  ;;  %v2003_v42 = vpop.eup %2002 }
0x1443   :  { %v1450_v44 = vadd.f32 1.0, %v2003_v42  ;;  %v2005_v45 = vpop.eup %2004 }
0x1444   :  { %v1525_v47 = vadd.f32 1.0, %v2005_v45 }
0x1445   :  { %2006 = vrcp.f32 %v1450_v44 }
0x1446   :  { %2008 = vrcp.f32 %v1525_v47 }
0x144f   :  { %v2007_v48 = vpop.eup %2006 }
0x1450   :  { %v2009_v50 = vpop.eup %2008  ;;  %v1454_v53 = vmul.f32 %v2007_v48, %v2448_v62 }
0x1451   :  { %v1529_v58 = vmul.f32 %v2009_v50, %v2452_v6  ;;  %v321_v6 = vrot.slane %v2187_v57, %v307_v9  ;;  %v855_v57 = vrot.slane %v2325_v31, %v307_v9  ;;  %v1389_v31 = vrot.slane %v2461_v17, %v307_v9 }
0x14b0   :  { %v1457_v16 = vpop.permute.xlu0 %1456 }
0x14b1   :  { %v1459_v49 = vmul.f32 %v2007_v48, %v1457_v16 }
0x14b3   :  { %1461 = vrot.lane.b32.xlu0 %v1459_v49, %s2042_s2 }
0x14b4   :  { %v1532_v51 = vpop.permute.xlu1 %1531 }
0x14b5   :  { %v1534_v52 = vmul.f32 %v2009_v50, %v1532_v51 }
0x14b7   :  { %1536 = vrot.lane.b32.xlu1 %v1534_v52, %s2042_s2 }
0x1525   :  { %v1462_v55 = vpop.permute.xlu0 %1461 }
0x1526   :  { %v1464_v56 = vadd.f32 %v1462_v55, %v1454_v53 }
0x1528   :  { %2010 = vtanh.f32 %v1464_v56  ;;  %v1579_v25 = vrot.slane %v1464_v56, %v307_v9 }
0x1529   :  { %v1537_v63 = vpop.permute.xlu1 %1536 }
0x152a   :  { %v1539_v5 = vadd.f32 %v1537_v63, %v1529_v58 }
0x152c   :  { %2012 = vtanh.f32 %v1539_v5  ;;  %v1592_v17 = vrot.slane %v1539_v5, %v307_v9 }
0x1532   :  { %v2011_v11 = vpop.eup %2010 }
0x1533   :  { %1467 = vrot.lane.b32.xlu0 %v2011_v11, %s2043_s26 }
0x1536   :  { %v2013_v62 = vpop.eup %2012 }
0x1537   :  { %1542 = vrot.lane.b32.xlu1 %v2013_v62, %s2043_s26  ;;  %309 = vrot.lane.b32.xlu0 %v308_v12, %s2042_s2 }
0x153b   :  { %322 = vrot.lane.b32.xlu1 %v321_v6, %s2042_s2  ;;  %487 = vrot.lane.b32.xlu0 %v486_v15, %s2042_s2 }
0x153f   :  { %500 = vrot.lane.b32.xlu1 %v499_v19, %s2042_s2  ;;  %665 = vrot.lane.b32.xlu0 %v664_v21, %s2042_s2 }
0x1543   :  { %678 = vrot.lane.b32.xlu1 %v677_v54, %s2042_s2  ;;  %843 = vrot.lane.b32.xlu0 %v842_v22, %s2042_s2 }
0x1547   :  { %856 = vrot.lane.b32.xlu1 %v855_v57, %s2042_s2  ;;  %1021 = vrot.lane.b32.xlu0 %v1020_v43, %s2042_s2 }
0x154b   :  { %1034 = vrot.lane.b32.xlu1 %v1033_v46, %s2042_s2  ;;  %1199 = vrot.lane.b32.xlu0 %v1198_v34, %s2042_s2 }
0x154f   :  { %1212 = vrot.lane.b32.xlu1 %v1211_v37, %s2042_s2  ;;  %1377 = vrot.lane.b32.xlu0 %v1376_v27, %s2042_s2 }
0x1553   :  { %1390 = vrot.lane.b32.xlu1 %v1389_v31, %s2042_s2 }
0x15a5   :  { %v1468_v20 = vpop.permute.xlu0 %1467 }
0x15a6   :  { %v1470_v26 = vmul.f32 %v2007_v48, %v1468_v20 }
0x15a8   :  { %v1553_v24 = vrot.slane %v1470_v26, %v307_v9 }
0x15a9   :  { %v1543_v13 = vpop.permute.xlu1 %1542  ;;  %v310_v18 = vpop.permute.xlu0 %309 }
0x15aa   :  { %v1545_v23 = vmul.f32 %v2009_v50, %v1543_v13  ;;  %313 = vst.msk [vmem:[%s2591_s6] sm:$0x3] %vm75_vm0, %v310_v18  ;;  %1554 = vrot.lane.b32.xlu0 %v1553_v24, %s2042_s2 }
0x15ac   :  { %v1566_v10 = vrot.slane %v1545_v23, %v307_v9 }
0x15ad   :  { %v323_v28 = vpop.permute.xlu1 %322  ;;  %v488_v1 = vpop.permute.xlu0 %487 }
0x15ae   :  { %1644 = vst.msk [vmem:[%s2592_s7 + $0xe] sm:$0x3] %vm75_vm0, %v323_v28  ;;  %1651 = vst.msk [vmem:[%s2591_s6 + $0x2] sm:$0x3] %vm75_vm0, %v488_v1  ;;  %1567 = vrot.lane.b32.xlu1 %v1566_v10, %s2042_s2  ;;  %1580 = vrot.lane.b32.xlu0 %v1579_v25, %s2045_s12 }
0x15b1   :  { %v501_v29 = vpop.permute.xlu1 %500  ;;  %v666_v30 = vpop.permute.xlu0 %665 }
0x15b2   :  { %1652 = vst.msk [vmem:[%s2592_s7 + $0xc] sm:$0x3] %vm75_vm0, %v501_v29  ;;  %1659 = vst.msk [vmem:[%s2591_s6 + $0x4] sm:$0x3] %vm75_vm0, %v666_v30  ;;  %1593 = vrot.lane.b32.xlu1 %v1592_v17, %s2045_s12 }
0x15b5   :  { %v679_v2 = vpop.permute.xlu1 %678  ;;  %v844_v32 = vpop.permute.xlu0 %843 }
0x15b6   :  { %1660 = vst.msk [vmem:[%s2592_s7 + $0xa] sm:$0x3] %vm75_vm0, %v679_v2  ;;  %1667 = vst.msk [vmem:[%s2591_s6 + $0x6] sm:$0x3] %vm75_vm0, %v844_v32 }
0x15b9   :  { %v857_v3 = vpop.permute.xlu1 %856  ;;  %v1022_v33 = vpop.permute.xlu0 %1021 }
0x15ba   :  { %1668 = vst.msk [vmem:[%s2592_s7 + $0x8] sm:$0x3] %vm75_vm0, %v857_v3  ;;  %1675 = vst.msk [vmem:[%s2591_s6 + $0x8] sm:$0x3] %vm75_vm0, %v1022_v33 }
0x15bd   :  { %v1035_v35 = vpop.permute.xlu1 %1034  ;;  %v1200_v36 = vpop.permute.xlu0 %1199 }
0x15be   :  { %1676 = vst.msk [vmem:[%s2592_s7 + $0x6] sm:$0x3] %vm75_vm0, %v1035_v35  ;;  %1683 = vst.msk [vmem:[%s2591_s6 + $0xa] sm:$0x3] %vm75_vm0, %v1200_v36 }
0x15c1   :  { %v1213_v0 = vpop.permute.xlu1 %1212  ;;  %v1378_v4 = vpop.permute.xlu0 %1377 }
0x15c2   :  { %1684 = vst.msk [vmem:[%s2592_s7 + $0x4] sm:$0x3] %vm75_vm0, %v1213_v0  ;;  %1691 = vst.msk [vmem:[%s2591_s6 + $0xc] sm:$0x3] %vm75_vm0, %v1378_v4 }
0x15c5   :  { %v1391_v38 = vpop.permute.xlu1 %1390 }
0x15c6   :  { %1692 = vst.msk [vmem:[%s2592_s7 + $0x2] sm:$0x3] %vm75_vm0, %v1391_v38 }
0x161c   :  { %v1555_v39 = vpop.permute.xlu0 %1554 }
0x161d   :  { %1698 = vst.msk [vmem:[%s2591_s6 + $0xe] sm:$0x3] %vm75_vm0, %v1555_v39  ;;  %1571 = vst.msk [vmem:[#allocation2] sm:$0x3] %vm75_vm0, %v1555_v39 }
0x1620   :  { %v1568_v14 = vpop.permute.xlu1 %1567  ;;  %v1581_v40 = vpop.permute.xlu0 %1580 }
0x1621   :  { %1570 = vst.msk [vmem:[%s2592_s7] sm:$0x3] %vm75_vm0, %v1568_v14  ;;  %1584 = vst.msk [vmem:[#allocation2 + $0x4] sm:$0x3] %vm75_vm0, %v1568_v14 }
0x1622   :  { %1583 = vst.msk [vmem:[#allocation2 + $0x2] sm:$0x3] %vm75_vm0, %v1581_v40 }
0x1624   :  { %v1594_v41 = vpop.permute.xlu1 %1593 }
0x1625   :  { %1596 = vst.msk [vmem:[#allocation2 + $0x6] sm:$0x3] %vm75_vm0, %v1594_v41 }
0x1626   :  { %1619 = vsyncpa [#allocation4], 1 }

</bundles_post_ra>
